<compile_context>
chip_gen: v7x
topology: tpu7x:2x2x1
jax: 0.10.0
libtpu: 0.0.40
codegen_flags: <defaults>
</compile_context>

<pallas_src>
import functools
import math

import jax
import jax.numpy as jnp
from jax import lax
from jax.experimental import pallas as pl
from jax.experimental.pallas import tpu as pltpu


def _largest_divisor_at_most(n: int, cap: int) -> int:
    """Largest divisor of `n` that is <= cap (always >= 1)."""
    cap = max(1, min(cap, n))
    best = 1
    d = 1
    while d * d <= n:
        if n % d == 0:
            for c in (d, n // d):
                if best < c <= cap:
                    best = c
        d += 1
    return best


# ---------------------------------------------------------------------------
# Conv2d(3 -> 64, k=3, stride=1, padding=1), NHWC, row-tiled with a 2-row halo.
# The 3x3 window is im2col'ed in-kernel (concat of 9 shifted slices) so the
# whole tile is ONE (th*W, 27) @ (27, 64) MXU matmul.
# ---------------------------------------------------------------------------
def _conv3x3_kernel(x_ref, w_ref, b_ref, o_ref):
    # x_ref: (1, 1, th+2, W+2, Cin)   haloed row slab of the zero-padded input
    # w_ref: (27, Cout)               im2col weight, (kh, kw, cin) row order
    # b_ref: (1, Cout)
    # o_ref: (1, th, W, Cout)         bf16 NHWC activation tile
    th, W, Cout = o_ref.shape[1], o_ref.shape[2], o_ref.shape[3]
    Cin = x_ref.shape[4]

    x = x_ref[0, 0]                                          # (th+2, W+2, Cin)
    # im2col: concatenate the 9 shifted windows along the contraction axis.
    patches = jnp.concatenate(
        [x[kh:kh + th, kw:kw + W, :] for kh in range(3) for kw in range(3)],
        axis=-1)                                             # (th, W, 27)
    patches = patches.reshape(th * W, 3 * 3 * Cin)           # leading-dim merge

    acc = jnp.dot(patches, w_ref[...],
                  preferred_element_type=jnp.float32)        # (th*W, Cout)
    acc = acc + b_ref[0].astype(jnp.float32)
    o_ref[0] = acc.reshape(th, W, Cout).astype(o_ref.dtype)


def conv2d_3x3_same(x_nhwc, w27, b, *, row_tile=None, out_dtype=jnp.bfloat16):
    N, H, W, Cin = x_nhwc.shape
    Cout = w27.shape[1]
    if row_tile is None:
        row_tile = _largest_divisor_at_most(H, 64)   # H=244 -> 61
    assert H % row_tile == 0
    th = row_tile
    n_rt = H // th

    # Overlapping (2-row halo) row slabs, built once in the wrapper.  The input
    # is by far the smallest tensor of this model (3 channels), so this copy is
    # negligible next to the FC weight stream and keeps the conv BlockSpecs
    # plain Blocked windows (no overlapping-window indexing in the kernel).
    x_pad = jnp.pad(x_nhwc, ((0, 0), (1, 1), (1, 1), (0, 0)))
    slabs = jnp.stack(
        [x_pad[:, r * th:r * th + th + 2] for r in range(n_rt)],
        axis=1)                                   # (N, n_rt, th+2, W+2, Cin)

    return pl.pallas_call(
        _conv3x3_kernel,
        out_shape=jax.ShapeDtypeStruct((N, H, W, Cout), out_dtype),
        grid=(N, n_rt),
        in_specs=[
            pl.BlockSpec((1, 1, th + 2, W + 2, Cin),
                         lambda n, r: (n, r, 0, 0, 0)),
            pl.BlockSpec((3 * 3 * Cin, Cout), lambda n, r: (0, 0)),
            pl.BlockSpec((1, Cout), lambda n, r: (0, 0)),
        ],
        out_specs=pl.BlockSpec((1, th, W, Cout), lambda n, r: (n, r, 0, 0)),
        compiler_params=pltpu.CompilerParams(
            dimension_semantics=("parallel", "parallel"),
            vmem_limit_bytes=48 * 1024 * 1024),
    )(slabs, w27, b)


# ---------------------------------------------------------------------------
# Linear(K -> num_classes): lane-dense (C, K) bf16 weight streamed in large
# divisor-sized K tiles, f32 accumulation directly in the resident output
# block, split-K "parallel" leading axis for v7x megacore.
# ---------------------------------------------------------------------------
def _fc_kernel(x_ref, w_ref, b_ref, o_ref):
    # x_ref: (N, tk)    bf16 features (NHWC flatten order)
    # w_ref: (C, tk)    bf16, K on the 128-lane axis (lane-dense, contiguous DMA)
    # b_ref: (1, C)     f32
    # o_ref: (1, N, C)  f32 partial output of this split (resident accumulator)
    p = pl.program_id(0)
    j = pl.program_id(1)

    @pl.when(j == 0)
    def _():
        o_ref[...] = jnp.zeros_like(o_ref)

    o_ref[0] += lax.dot_general(
        x_ref[...], w_ref[...],
        dimension_numbers=(((1,), (1,)), ((), ())),
        preferred_element_type=jnp.float32)                  # (N, C)

    @pl.when(jnp.logical_and(j == pl.num_programs(1) - 1, p == 0))
    def _():
        o_ref[0] += b_ref[...].astype(jnp.float32)


def linear_lane_dense(feat, w_ck, b, *, tk_elems=None, nsplit=2):
    # feat: (N, K) bf16, w_ck: (C, K) bf16, b: (1, C) f32
    N, K = feat.shape
    C = w_ck.shape[0]
    if tk_elems is None:
        tk_elems = 256 * 1024            # ~0.5 MB bf16 per weight tile
    tk = _largest_divisor_at_most(K, tk_elems)   # always divides K (no tail)
    n_kt = K // tk
    nsplit = math.gcd(max(1, nsplit), n_kt)
    n_kps = n_kt // nsplit               # k-steps per split

    partials = pl.pallas_call(
        _fc_kernel,
        out_shape=jax.ShapeDtypeStruct((nsplit, N, C), jnp.float32),
        grid=(nsplit, n_kps),
        in_specs=[
            pl.BlockSpec((N, tk), lambda p, j: (0, p * n_kps + j)),
            pl.BlockSpec((C, tk), lambda p, j: (0, p * n_kps + j)),
            pl.BlockSpec((1, C), lambda p, j: (0, 0)),
        ],
        out_specs=pl.BlockSpec((1, N, C), lambda p, j: (p, 0, 0)),
        compiler_params=pltpu.CompilerParams(
            dimension_semantics=("parallel", "arbitrary"),
            vmem_limit_bytes=48 * 1024 * 1024),
    )(feat, w_ck, b)
    # Tiny epilogue: sum the <= nsplit split-K partials, shape (nsplit, N, C).
    return partials.sum(axis=0)


# ---------------------------------------------------------------------------
# Parameters: PyTorch-convention init + one-time re-layout for the kernels.
# ---------------------------------------------------------------------------
def init_params(key, H, W, cin=3, cout=64, num_classes=4):
    k1, k2, k3, k4 = jax.random.split(key, 4)
    bc = 1.0 / math.sqrt(cin * 3 * 3)
    fan_in_fc = cout * H * W
    bf = 1.0 / math.sqrt(fan_in_fc)
    return {
        # PyTorch conventions: conv (O, I, kH, kW), fc (out_features, in_features)
        "conv_w": jax.random.uniform(k1, (cout, cin, 3, 3), jnp.float32, -bc, bc),
        "conv_b": jax.random.uniform(k2, (cout,), jnp.float32, -bc, bc),
        "fc_w": jax.random.uniform(k3, (num_classes, fan_in_fc), jnp.float32, -bf, bf),
        "fc_b": jax.random.uniform(k4, (num_classes,), jnp.float32, -bf, bf),
    }


def prepare_params(params, H, W):
    """One-time re-layout (outside the hot forward / jit).

    * conv weight OIHW -> (27, Cout) im2col matrix, (kh, kw, cin) row order.
    * fc weight rows reordered from PyTorch's (c, h, w) flatten order to the
      NHWC (h, w, c) order produced by the conv kernel, stored lane-dense as a
      (num_classes, K) bf16 matrix -> no transpose of the big weight per call.
    """
    cout, cin = params["conv_w"].shape[0], params["conv_w"].shape[1]
    num_classes = params["fc_w"].shape[0]
    w27 = jnp.transpose(params["conv_w"], (2, 3, 1, 0)).reshape(9 * cin, cout)
    fc_w_nhwc = (params["fc_w"].reshape(num_classes, cout, H, W)
                 .transpose(0, 2, 3, 1)
                 .reshape(num_classes, H * W * cout))
    return {
        "conv_w27": w27.astype(jnp.float32),
        "conv_b": params["conv_b"].reshape(1, cout).astype(jnp.float32),
        "fc_w": fc_w_nhwc.astype(jnp.bfloat16),
        "fc_b": params["fc_b"].reshape(1, num_classes).astype(jnp.float32),
    }


# ---------------------------------------------------------------------------
# Forward (matches Classifier.forward semantics)
# ---------------------------------------------------------------------------
@functools.partial(jax.jit,
                   static_argnames=("row_tile", "fc_tile_elems", "fc_splits"))
def classifier_forward(prep, x_nchw, *, row_tile=None, fc_tile_elems=None,
                       fc_splits=2):
    N = x_nchw.shape[0]
    # NCHW -> NHWC for the conv (the input is the small tensor of this model).
    x_nhwc = jnp.transpose(x_nchw, (0, 2, 3, 1))
    y = conv2d_3x3_same(x_nhwc, prep["conv_w27"], prep["conv_b"],
                        row_tile=row_tile)                 # (N, H, W, 64) bf16
    # Free contiguous reshape; NHWC flatten order matches the prepped fc_w.
    feat = y.reshape(N, -1)
    return linear_lane_dense(feat, prep["fc_w"], prep["fc_b"],
                             tk_elems=fc_tile_elems, nsplit=fc_splits)


def _reference_forward(params, x_nchw):
    y = lax.conv_general_dilated(
        x_nchw, params["conv_w"], window_strides=(1, 1), padding="SAME",
        dimension_numbers=("NCHW", "OIHW", "NCHW"))
    y = y + params["conv_b"].reshape(1, -1, 1, 1)
    feat = y.reshape(y.shape[0], -1)
    return feat @ params["fc_w"].T + params["fc_b"]


if __name__ == "__main__":
    # Small demo shapes consistent with the module (original module: H=W=244).
    N, Cin, H, W = 2, 3, 16, 16
    key = jax.random.PRNGKey(0)
    kx, kp = jax.random.split(key)
    x = jax.random.normal(kx, (N, Cin, H, W), jnp.float32)
    params = init_params(kp, H, W)
    prep = prepare_params(params, H, W)     # one-time re-layout, outside jit

    # Small tiles so the demo exercises multi-tile conv rows, multi-step FC
    # accumulation and the split-K parallel axis; at the real 244x244 size the
    # defaults pick row_tile=61 and ~238K-element (~0.5 MB bf16) FC tiles.
    out = classifier_forward(prep, x, row_tile=8, fc_tile_elems=4096,
                             fc_splits=2)
    out = jax.block_until_ready(out)

    ref = _reference_forward(params, x)
    assert out.shape == (N, 4), out.shape
    err = float(jnp.max(jnp.abs(out - ref)))
    # FC weight/features are streamed in bf16 (f32 accumulation) -> loose tol.
    assert jnp.allclose(out, ref, atol=2e-2, rtol=2e-2), f"max abs err {err}"

    print("KERNEL_OK")
</pallas_src>

<mosaic_0001>
module attributes {stable_mosaic.version = 11 : i64} {
  func.func @_conv3x3_kernel(%arg0: i32, %arg1: i32, %arg2: memref<1x1x10x18x3xf32, #tpu.memory_space<vmem>>, %arg3: memref<27x64xf32, #tpu.memory_space<vmem>>, %arg4: memref<1x64xf32, #tpu.memory_space<vmem>>, %arg5: memref<1x8x16x64xbf16, #tpu.memory_space<vmem>>) attributes {dimension_semantics = [#tpu.dimension_semantics<parallel>, #tpu.dimension_semantics<parallel>], iteration_bounds = array<i64: 2, 2>, scalar_prefetch = 0 : i64, scratch_operands = 0 : i64, tpu.core_type = #tpu.core_type<tc>, window_params = [{transform_indices = @transform_0, window_bounds = array<i64: 1, 1, 10, 18, 3>}, {pipeline_mode = #tpu.pipeline_mode<synchronous>, transform_indices = @transform_1, window_bounds = array<i64: 27, 64>}, {pipeline_mode = #tpu.pipeline_mode<synchronous>, transform_indices = @transform_2, window_bounds = array<i64: 1, 64>}, {transform_indices = @transform_3, window_bounds = array<i64: 1, 8, 16, 64>}]} {
    %c0 = arith.constant 0 : index
    %c0_0 = arith.constant 0 : index
    %c0_1 = arith.constant 0 : index
    %c0_2 = arith.constant 0 : index
    %c0_3 = arith.constant 0 : index
    %0 = vector.load %arg2[%c0, %c0_0, %c0_1, %c0_2, %c0_3] : memref<1x1x10x18x3xf32, #tpu.memory_space<vmem>>, vector<1x1x10x18x3xf32>
    %1 = vector.shape_cast %0 : vector<1x1x10x18x3xf32> to vector<10x18x3xf32>
    %2 = vector.extract_strided_slice %1 {offsets = [0, 0, 0], sizes = [8, 16, 3], strides = [1, 1, 1]} : vector<10x18x3xf32> to vector<8x16x3xf32>
    %3 = vector.extract_strided_slice %1 {offsets = [0, 1, 0], sizes = [8, 16, 3], strides = [1, 1, 1]} : vector<10x18x3xf32> to vector<8x16x3xf32>
    %4 = vector.extract_strided_slice %1 {offsets = [0, 2, 0], sizes = [8, 16, 3], strides = [1, 1, 1]} : vector<10x18x3xf32> to vector<8x16x3xf32>
    %5 = vector.extract_strided_slice %1 {offsets = [1, 0, 0], sizes = [8, 16, 3], strides = [1, 1, 1]} : vector<10x18x3xf32> to vector<8x16x3xf32>
    %6 = vector.extract_strided_slice %1 {offsets = [1, 1, 0], sizes = [8, 16, 3], strides = [1, 1, 1]} : vector<10x18x3xf32> to vector<8x16x3xf32>
    %7 = vector.extract_strided_slice %1 {offsets = [1, 2, 0], sizes = [8, 16, 3], strides = [1, 1, 1]} : vector<10x18x3xf32> to vector<8x16x3xf32>
    %8 = vector.extract_strided_slice %1 {offsets = [2, 0, 0], sizes = [8, 16, 3], strides = [1, 1, 1]} : vector<10x18x3xf32> to vector<8x16x3xf32>
    %9 = vector.extract_strided_slice %1 {offsets = [2, 1, 0], sizes = [8, 16, 3], strides = [1, 1, 1]} : vector<10x18x3xf32> to vector<8x16x3xf32>
    %10 = vector.extract_strided_slice %1 {offsets = [2, 2, 0], sizes = [8, 16, 3], strides = [1, 1, 1]} : vector<10x18x3xf32> to vector<8x16x3xf32>
    %11 = tpu.concatenate %2, %3, %4, %5, %6, %7, %8, %9, %10 in 2 : vector<8x16x3xf32>, vector<8x16x3xf32>, vector<8x16x3xf32>, vector<8x16x3xf32>, vector<8x16x3xf32>, vector<8x16x3xf32>, vector<8x16x3xf32>, vector<8x16x3xf32>, vector<8x16x3xf32> -> vector<8x16x27xf32>
    %12 = vector.shape_cast %11 : vector<8x16x27xf32> to vector<128x27xf32>
    %c0_4 = arith.constant 0 : index
    %c0_5 = arith.constant 0 : index
    %13 = vector.load %arg3[%c0_4, %c0_5] : memref<27x64xf32, #tpu.memory_space<vmem>>, vector<27x64xf32>
    %cst = arith.constant dense<0.000000e+00> : vector<128x64xf32>
    %14 = tpu.matmul %12, %13, %cst {dimension_numbers = #tpu.dot_dimension_numbers<[1], [0], [0], [1], [0, 0, 1, 1], [], []>} : vector<128x27xf32>, vector<27x64xf32>, vector<128x64xf32> -> vector<128x64xf32>
    %c0_6 = arith.constant 0 : index
    %c0_7 = arith.constant 0 : index
    %15 = vector.load %arg4[%c0_6, %c0_7] : memref<1x64xf32, #tpu.memory_space<vmem>>, vector<1x64xf32>
    %16 = vector.shape_cast %15 : vector<1x64xf32> to vector<64xf32>
    %17 = vector.shape_cast %16 : vector<64xf32> to vector<1x64xf32>
    %18 = vector.broadcast %17 : vector<1x64xf32> to vector<128x64xf32>
    %19 = arith.addf %14, %18 : vector<128x64xf32>
    %20 = vector.shape_cast %19 : vector<128x64xf32> to vector<8x16x64xf32>
    %21 = arith.truncf %20 : vector<8x16x64xf32> to vector<8x16x64xbf16>
    %c0_8 = arith.constant 0 : index
    %c0_9 = arith.constant 0 : index
    %c0_10 = arith.constant 0 : index
    %c0_11 = arith.constant 0 : index
    %22 = vector.load %arg5[%c0_8, %c0_9, %c0_10, %c0_11] : memref<1x8x16x64xbf16, #tpu.memory_space<vmem>>, vector<1x8x16x64xbf16>
    %23 = vector.shape_cast %22 : vector<1x8x16x64xbf16> to vector<8x16x64xbf16>
    %24 = vector.shape_cast %21 : vector<8x16x64xbf16> to vector<1x8x16x64xbf16>
    tpu.vector_store %arg5[%c0_8, %c0_9, %c0_10, %c0_11], %24 {strides = array<i32>} : memref<1x8x16x64xbf16, #tpu.memory_space<vmem>>, vector<1x8x16x64xbf16>,
    return
  }
  func.func @transform_0(%arg0: i32, %arg1: i32) -> (i32, i32, i32, i32, i32) {
    %c0_i32 = arith.constant 0 : i32
    %c0_i32_0 = arith.constant 0 : i32
    %c0_i32_1 = arith.constant 0 : i32
    %c0_i32_2 = arith.constant 0 : i32
    return %arg0, %arg1, %c0_i32, %c0_i32_0, %c0_i32_1 : i32, i32, i32, i32, i32
  }
  func.func @transform_1(%arg0: i32, %arg1: i32) -> (i32, i32) {
    %c0_i32 = arith.constant 0 : i32
    %c0_i32_0 = arith.constant 0 : i32
    %c0_i32_1 = arith.constant 0 : i32
    return %c0_i32, %c0_i32_0 : i32, i32
  }
  func.func @transform_2(%arg0: i32, %arg1: i32) -> (i32, i32) {
    %c0_i32 = arith.constant 0 : i32
    %c0_i32_0 = arith.constant 0 : i32
    %c0_i32_1 = arith.constant 0 : i32
    return %c0_i32, %c0_i32_0 : i32, i32
  }
  func.func @transform_3(%arg0: i32, %arg1: i32) -> (i32, i32, i32, i32) {
    %c0_i32 = arith.constant 0 : i32
    %c0_i32_0 = arith.constant 0 : i32
    %c0_i32_1 = arith.constant 0 : i32
    return %arg0, %arg1, %c0_i32, %c0_i32_0 : i32, i32, i32, i32
  }
}

module attributes {stable_mosaic.version = 11 : i64} {
  func.func @_fc_kernel(%arg0: i32, %arg1: i32, %arg2: memref<2x4096xbf16, #tpu.memory_space<vmem>>, %arg3: memref<4x4096xbf16, #tpu.memory_space<vmem>>, %arg4: memref<1x4xf32, #tpu.memory_space<vmem>>, %arg5: memref<1x2x4xf32, #tpu.memory_space<vmem>>) attributes {dimension_semantics = [#tpu.dimension_semantics<parallel>, #tpu.dimension_semantics<arbitrary>], iteration_bounds = array<i64: 2, 2>, scalar_prefetch = 0 : i64, scratch_operands = 0 : i64, tpu.core_type = #tpu.core_type<tc>, window_params = [{transform_indices = @transform_0, window_bounds = array<i64: 2, 4096>}, {transform_indices = @transform_1, window_bounds = array<i64: 4, 4096>}, {pipeline_mode = #tpu.pipeline_mode<synchronous>, transform_indices = @transform_2, window_bounds = array<i64: 1, 4>}, {transform_indices = @transform_3, window_bounds = array<i64: 1, 2, 4>}]} {
    %c0_i32 = arith.constant 0 : i32
    %0 = arith.cmpi eq, %arg1, %c0_i32 : i32
    %1 = arith.extui %0 : i1 to i32
    %c0_i32_0 = arith.constant 0 : i32
    %2 = arith.cmpi ne, %1, %c0_i32_0 : i32
    scf.if %2 {
      %cst_12 = arith.constant 0.000000e+00 : f32
      %17 = vector.broadcast %cst_12 : f32 to vector<1x2x4xf32>
      %c0_13 = arith.constant 0 : index
      %c0_14 = arith.constant 0 : index
      %c0_15 = arith.constant 0 : index
      %18 = vector.load %arg5[%c0_13, %c0_14, %c0_15] : memref<1x2x4xf32, #tpu.memory_space<vmem>>, vector<1x2x4xf32>
      tpu.vector_store %arg5[%c0_13, %c0_14, %c0_15], %17 {strides = array<i32>} : memref<1x2x4xf32, #tpu.memory_space<vmem>>, vector<1x2x4xf32>,
    } else {
    }
    %c0 = arith.constant 0 : index
    %c0_1 = arith.constant 0 : index
    %c0_2 = arith.constant 0 : index
    %3 = vector.load %arg5[%c0, %c0_1, %c0_2] : memref<1x2x4xf32, #tpu.memory_space<vmem>>, vector<1x2x4xf32>
    %4 = vector.shape_cast %3 : vector<1x2x4xf32> to vector<2x4xf32>
    %c0_3 = arith.constant 0 : index
    %c0_4 = arith.constant 0 : index
    %5 = vector.load %arg2[%c0_3, %c0_4] : memref<2x4096xbf16, #tpu.memory_space<vmem>>, vector<2x4096xbf16>
    %c0_5 = arith.constant 0 : index
    %c0_6 = arith.constant 0 : index
    %6 = vector.load %arg3[%c0_5, %c0_6] : memref<4x4096xbf16, #tpu.memory_space<vmem>>, vector<4x4096xbf16>
    %cst = arith.constant dense<0.000000e+00> : vector<2x4xf32>
    %7 = tpu.matmul %5, %6, %cst {dimension_numbers = #tpu.dot_dimension_numbers<[1], [1], [0], [0], [0, 0, 1, 0], [], []>} : vector<2x4096xbf16>, vector<4x4096xbf16>, vector<2x4xf32> -> vector<2x4xf32>
    %8 = arith.addf %4, %7 : vector<2x4xf32>
    %c0_7 = arith.constant 0 : index
    %c0_8 = arith.constant 0 : index
    %c0_9 = arith.constant 0 : index
    %9 = vector.load %arg5[%c0_7, %c0_8, %c0_9] : memref<1x2x4xf32, #tpu.memory_space<vmem>>, vector<1x2x4xf32>
    %10 = vector.shape_cast %9 : vector<1x2x4xf32> to vector<2x4xf32>
    %11 = vector.shape_cast %8 : vector<2x4xf32> to vector<1x2x4xf32>
    tpu.vector_store %arg5[%c0_7, %c0_8, %c0_9], %11 {strides = array<i32>} : memref<1x2x4xf32, #tpu.memory_space<vmem>>, vector<1x2x4xf32>,
    %c1_i32 = arith.constant 1 : i32
    %12 = arith.cmpi eq, %arg1, %c1_i32 : i32
    %c0_i32_10 = arith.constant 0 : i32
    %13 = arith.cmpi eq, %arg0, %c0_i32_10 : i32
    %14 = arith.andi %12, %13 : i1
    %15 = arith.extui %14 : i1 to i32
    %c0_i32_11 = arith.constant 0 : i32
    %16 = arith.cmpi ne, %15, %c0_i32_11 : i32
    scf.if %16 {
      %c0_12 = arith.constant 0 : index
      %c0_13 = arith.constant 0 : index
      %c0_14 = arith.constant 0 : index
      %17 = vector.load %arg5[%c0_12, %c0_13, %c0_14] : memref<1x2x4xf32, #tpu.memory_space<vmem>>, vector<1x2x4xf32>
      %18 = vector.shape_cast %17 : vector<1x2x4xf32> to vector<2x4xf32>
      %c0_15 = arith.constant 0 : index
      %c0_16 = arith.constant 0 : index
      %19 = vector.load %arg4[%c0_15, %c0_16] : memref<1x4xf32, #tpu.memory_space<vmem>>, vector<1x4xf32>
      %20 = vector.broadcast %19 : vector<1x4xf32> to vector<2x4xf32>
      %21 = arith.addf %18, %20 : vector<2x4xf32>
      %c0_17 = arith.constant 0 : index
      %c0_18 = arith.constant 0 : index
      %c0_19 = arith.constant 0 : index
      %22 = vector.load %arg5[%c0_17, %c0_18, %c0_19] : memref<1x2x4xf32, #tpu.memory_space<vmem>>, vector<1x2x4xf32>
      %23 = vector.shape_cast %22 : vector<1x2x4xf32> to vector<2x4xf32>
      %24 = vector.shape_cast %21 : vector<2x4xf32> to vector<1x2x4xf32>
      tpu.vector_store %arg5[%c0_17, %c0_18, %c0_19], %24 {strides = array<i32>} : memref<1x2x4xf32, #tpu.memory_space<vmem>>, vector<1x2x4xf32>,
    } else {
    }
    return
  }
  func.func @transform_0(%arg0: i32, %arg1: i32) -> (i32, i32) {
    %c2_i32 = arith.constant 2 : i32
    %0 = arith.muli %arg0, %c2_i32 : i32
    %1 = arith.addi %0, %arg1 : i32
    %c0_i32 = arith.constant 0 : i32
    %c0_i32_0 = arith.constant 0 : i32
    return %c0_i32, %1 : i32, i32
  }
  func.func @transform_1(%arg0: i32, %arg1: i32) -> (i32, i32) {
    %c2_i32 = arith.constant 2 : i32
    %0 = arith.muli %arg0, %c2_i32 : i32
    %1 = arith.addi %0, %arg1 : i32
    %c0_i32 = arith.constant 0 : i32
    %c0_i32_0 = arith.constant 0 : i32
    return %c0_i32, %1 : i32, i32
  }
  func.func @transform_2(%arg0: i32, %arg1: i32) -> (i32, i32) {
    %c0_i32 = arith.constant 0 : i32
    %c0_i32_0 = arith.constant 0 : i32
    %c0_i32_1 = arith.constant 0 : i32
    return %c0_i32, %c0_i32_0 : i32, i32
  }
  func.func @transform_3(%arg0: i32, %arg1: i32) -> (i32, i32, i32) {
    %c0_i32 = arith.constant 0 : i32
    %c0_i32_0 = arith.constant 0 : i32
    %c0_i32_1 = arith.constant 0 : i32
    return %arg0, %c0_i32, %c0_i32_0 : i32, i32, i32
  }
}

</mosaic_0001>

<bundles_post_ra>
// kernel: classifier_forward.2
= control target key start
LH: loop header
LB: loop body
LE: loop exit
PB: predicated region body
PF: predicated region fallthrough
CT: control target
= control target key end

     0   :  { %s1529_s12 = smov 0   ;;  %s1531_s13 = smov 0   ;;  %s2266_s0 = inlined_call_operand.vmem [shape: f32[2,2,10,18,3], index: 0, kind: input, shape index: {}]   ;;  %s2267_s1 = inlined_call_operand.vmem [shape: f32[27,64], index: 1, kind: input, shape index: {}]   ;;  %s2268_s2 = inlined_call_operand.vmem [shape: f32[1,64], index: 2, kind: input, shape index: {}]   ;;  %s2269_s3 = inlined_call_operand.vmem [shape: bf16[2,16,16,64], index: 3, kind: output, shape index: {}]  }
   0x1   :  { %s1533_s14 = smov 0   ;;  %s1535_s15 = smov 0  }
   0x2   :  { %s1537_s16 = smov 0  }
   0x3 LB: > { %s22_s17 = sadd.s32 1, %s1490_s14  ;;  %s25_s18 = sadd.s32 1, %s1494_s15  ;;  %s1498_s16 = sphi %s1537_s16, %s13_s16   ;;  %s1494_s15 = sphi %s1535_s15, %s2300_s15   ;;  %s1490_s14 = sphi %s1533_s14, %s2299_s14   ;;  %s1486_s13 = sphi %s1531_s13, %s2298_s13   ;;  %s1482_s12 = sphi %s1529_s12, %s2297_s12  }
   0x4   : > { %p23_p0 = scmp.ge.s32.totalorder %s22_s17, 2  ;;  %p1285_p1 = scmp.ge.s32.totalorder %s1498_s16, 1 }
   0x5   : > { %p157_p2 = scmp.lt.s32.totalorder %s1498_s16, 5 }
   0x6   : > { %s2302_s17 = smov (%p23_p0, %s22_s17), 0  ;;  %s2304_s18 = smov (!%p23_p0, %s25_s18), %s1494_s15 }
   0x7   : > { %p158_p3 = pnand %p1285_p1, %p157_p2  ;;  %p27_p4 = scmp.ge.s32.totalorder %s2304_s18, 2 }
   0x9   : > { %s2306_s18 = smov (%p27_p4, %s2304_s18), 0  ;;  %161 = sbr.rel (%p158_p3) target bundleno = 617 (0x269), region = 32 }
  0x10   : > { %p190_p5 = scmp.lt.s32.totalorder %s1486_s13, 1  ;;  %p192_p6 = scmp.lt.s32.totalorder %s1482_s12, 1  ;;  %vm264_vm0 = vcmask 1046528   ;;  %vm353_vm1 = vcmask 1045504   ;;  %vm952_vm2 = vcmask 1042432   ;;  %vm1508_vm3 = vmmov 1  }
  0x11   : > { %s1500_s27 = smov 3   ;;  %s1501_s28 = smov 6   ;;  %vm1400_vm4 = vmpackc.low %vm952_vm2, %vm1508_vm3  ;;  %vm756_vm5 = vcmask 23552   ;;  %vm773_vm6 = vcmask 48128   ;;  %vm790_vm7 = vcmask 72704   ;;  %vm807_vm8 = vcmask 97280  }
  0x12   : > { %s2308_s13 = smov (!%p190_p5, %s1486_s13), 1  ;;  %s1502_s29 = smov 9   ;;  %vm824_vm9 = vcmask 121856   ;;  %vm841_vm10 = vcmask 146432   ;;  %vm858_vm11 = vcmask 171008   ;;  %vm875_vm12 = vcmask 195584  }
  0x13   : > { %s193_s19 = scalar_select %p192_p6, %s1482_s12, 1  ;;  %vm903_vm13 = vcmask 220160   ;;  %vm1165_vm14 = vcmask 519168  }
  0x14   : > { %s1410_s20 = smul.u32 60, %s2308_s13  ;;  %s1503_s30 = smov 12  }
  0x15   : > { %s1409_s21 = smul.u32 30, %s193_s19  ;;  %s1504_s4 = smov 15  }
  0x16   : > { %s1505_s5 = smov 18   ;;  %s1506_s6 = smov 21  }
  0x17   : > { %s196_s22 = sadd.s32 %s1410_s20, %s1409_s21  ;;  %s1289_s25 = sshll.u32 %s2308_s13, 5 }
  0x18   : > { %s1286_s23 = sshll.u32 %s196_s22, 3  ;;  %s1507_s22 = smov 24  }
  0x19   : > { %s1569_s26 = scalar_lea.vmem %s2266_s0, %s1286_s23  ;;  %s1287_s23 = sshll.u32 %s1482_s12, 3 }
  0x1a   : > { %v1572_v0 = vld [vmem:[%s1569_s26 + $0x8] sm:$0xff]  ;;  %v212_v1 = vld [vmem:[%s1569_s26 + $0x10] sm:$0x3]  ;;  %v1576_v2 = vld [vmem:[%s1569_s26] sm:$0xff]  ;;  %p202_p7 = scmp.lt.s32.totalorder %s1287_s23, 15 }
  0x1b   : > { %v266_v3 = vrot.slane %v1572_v0, 1  ;;  %v268_v4 = vrot.slane %v212_v1, 1  ;;  %v265_v5 = vrot.slane %v1576_v2, 1  ;;  %v1581_v6 = vld [vmem:[%s1569_s26 + $0x68] sm:$0xff]  ;;  %v224_v7 = vld [vmem:[%s1569_s26 + $0x70] sm:$0x3] }
  0x1c   : > { %v286_v8 = vrot.slane %v1581_v6, 1  ;;  %v288_v9 = vrot.slane %v224_v7, 1  ;;  %v1586_v10 = vld [vmem:[%s1569_s26 + $0x60] sm:$0xff]  ;;  %v375_v14 = vrot.slane %v1581_v6, 2  ;;  %v354_v15 = vrot.slane %v1576_v2, 2  ;;  %v1622_v26 = vld [vmem:[%s1569_s26 + $0x78] sm:$0xff] }
  0x1d   : > { %v269_v11 = vsel %vm264_vm0, %v266_v3, %v268_v4  ;;  %v267_v12 = vsel %vm264_vm0, %v265_v5, %v266_v3  ;;  %v285_v13 = vrot.slane %v1586_v10, 1  ;;  %v374_v18 = vrot.slane %v1586_v10, 2  ;;  %v1625_v27 = vld [vmem:[%s1569_s26 + $0x18] sm:$0xff]  ;;  %v1628_v28 = vld [vmem:[%s1569_s26 + $0x80] sm:$0xff]  ;;  %v227_v36 = vld [vmem:[%s1569_s26 + $0x88] sm:$0x3] }
  0x1e   : > { %307 = vrot.lane.b32.xlu1 %v269_v11, %s1500_s27  ;;  %305 = vrot.lane.b32.xlu0 %v267_v12, %s1500_s27  ;;  %v1596_v16 = vsel %vm264_vm0, %v286_v8, %v288_v9  ;;  %v355_v19 = vrot.slane %v1572_v0, 2  ;;  %v377_v22 = vrot.slane %v224_v7, 2  ;;  %v357_v23 = vrot.slane %v212_v1, 2  ;;  %v1631_v29 = vld [vmem:[%s1569_s26 + $0x20] sm:$0xff]  ;;  %v215_v37 = vld [vmem:[%s1569_s26 + $0x28] sm:$0x3] }
  0x1f   : > { %v1599_v17 = vsel %vm264_vm0, %v285_v13, %v286_v8  ;;  %v1608_v20 = vsel %vm353_vm1, %v374_v18, %v375_v14  ;;  %v290_v30 = vrot.slane %v1622_v26, 1  ;;  %v291_v31 = vrot.slane %v1628_v28, 1  ;;  %v1689_v52 = vld [vmem:[%s1569_s26 + $0x90] sm:$0xff]  ;;  %v1702_v54 = vld [vmem:[%s1569_s26 + $0x98] sm:$0xff]  ;;  %v230_v62 = vld [vmem:[%s1569_s26 + $0xa0] sm:$0x3] }
  0x20   : > { %v356_v21 = vsel %vm353_vm1, %v354_v15, %v355_v19  ;;  %v1615_v24 = vsel %vm353_vm1, %v375_v14, %v377_v22  ;;  %v358_v25 = vsel %vm353_vm1, %v355_v19, %v357_v23  ;;  %v270_v32 = vrot.slane %v1625_v27, 1  ;;  %v1692_v53 = vld [vmem:[%s1569_s26 + $0x30] sm:$0xff]  ;;  %v1705_v55 = vld [vmem:[%s1569_s26 + $0x38] sm:$0xff]  ;;  %v218_v63 = vld [vmem:[%s1569_s26 + $0x40] sm:$0x3]  ;;  %s2310_s23 = smov (!%p202_p7, %s1287_s23), 15 }
  0x21   : > { %v271_v33 = vrot.slane %v1631_v29, 1  ;;  %v1646_v34 = vsel %vm264_vm0, %v290_v30, %v291_v31  ;;  %v293_v38 = vrot.slane %v227_v36, 1  ;;  %v273_v39 = vrot.slane %v215_v37, 1  ;;  %2283 = vst [vmem:[#allocation6_spill] sm:$0xff] %v1705_v55  ;;  %v892_v12 = vld [vmem:[%s2267_s1] sm:$0xff]  ;;  %v893_v13 = vld [vmem:[%s2267_s1 + $0x8] sm:$0xff] }
  0x22   : > { %323 = vrot.lane.b32.xlu1 %v1596_v16, %s1500_s27  ;;  %321 = vrot.lane.b32.xlu0 %v1599_v17, %s1500_s27  ;;  %2279 = vst [vmem:[#allocation2_spill] sm:$0xff] %v1646_v34  ;;  %v379_v40 = vrot.slane %v1622_v26, 2  ;;  %v380_v41 = vrot.slane %v1628_v28, 2  ;;  %v359_v44 = vrot.slane %v1625_v27, 2  ;;  %v360_v45 = vrot.slane %v1631_v29, 2  ;;  %v894_v19 = vld [vmem:[%s2267_s1 + $0x10] sm:$0xff] }
  0x23   : > { %v272_v35 = vsel %vm264_vm0, %v270_v32, %v271_v33  ;;  %v1660_v42 = vsel %vm264_vm0, %v291_v31, %v293_v38  ;;  %v274_v43 = vsel %vm264_vm0, %v271_v33, %v273_v39  ;;  %v382_v48 = vrot.slane %v227_v36, 2  ;;  %v1772_v32 = vld [vmem:[%s1569_s26 + $0xa8] sm:$0xff]  ;;  %s1288_s24 = sshll.u32 %s2310_s23, 1 }
  0x24   : > { %2280 = vst [vmem:[#allocation3_spill] sm:$0xff] %v1660_v42  ;;  %v1669_v46 = vsel %vm353_vm1, %v379_v40, %v380_v41  ;;  %v361_v47 = vsel %vm353_vm1, %v359_v44, %v360_v45  ;;  %v362_v49 = vrot.slane %v215_v37, 2  ;;  %v295_v56 = vrot.slane %v1689_v52, 1  ;;  %2284 = vst [vmem:[#allocation7_spill] sm:$0xff] %v1772_v32  ;;  %v1775_v33 = vld [vmem:[%s1569_s26 + $0x48] sm:$0xff] }
  0x25   : > { %2281 = vst [vmem:[#allocation4_spill] sm:$0xff] %v1669_v46  ;;  %v1682_v50 = vsel %vm353_vm1, %v380_v41, %v382_v48  ;;  %v296_v57 = vrot.slane %v1702_v54, 1  ;;  %v275_v58 = vrot.slane %v1692_v53, 1  ;;  %v276_v59 = vrot.slane %v1705_v55, 1  ;;  %2285 = vst [vmem:[#allocation8_spill] sm:$0xff] %v1775_v33  ;;  %v1796_v41 = vld [vmem:[%s1569_s26 + $0xb0] sm:$0xff] }
  0x26   : > { %410 = vrot.lane.b32.xlu1 %v1608_v20, %s1501_s28  ;;  %394 = vrot.lane.b32.xlu0 %v356_v21, %s1501_s28  ;;  %2282 = vst [vmem:[#allocation5_spill] sm:$0xff] %v1682_v50  ;;  %v363_v51 = vsel %vm353_vm1, %v360_v45, %v362_v49  ;;  %v298_v1 = vrot.slane %v230_v62, 1  ;;  %v278_v3 = vrot.slane %v218_v63, 1  ;;  %v384_v4 = vrot.slane %v1689_v52, 2  ;;  %v895_v21 = vld [vmem:[%s2267_s1 + $0x18] sm:$0x7] }
  0x27   : > { %v297_v60 = vsel %vm264_vm0, %v295_v56, %v296_v57  ;;  %v277_v61 = vsel %vm264_vm0, %v275_v58, %v276_v59  ;;  %v385_v5 = vrot.slane %v1702_v54, 2  ;;  %v364_v9 = vrot.slane %v1692_v53, 2  ;;  %2286 = vst [vmem:[#allocation9_spill] sm:$0xff] %v1796_v41 }
  0x28   : > { %v299_v7 = vsel %vm264_vm0, %v296_v57, %v298_v1  ;;  %v279_v8 = vsel %vm264_vm0, %v276_v59, %v278_v3  ;;  %v365_v11 = vrot.slane %v1705_v55, 2  ;;  %v1395_v14 = vpack.c.bf16 %v893_v13, %v892_v12 }
  0x29   : > { %v386_v15 = vsel %vm353_vm1, %v384_v4, %v385_v5  ;;  %v1399_v22 = vpack.c.bf16 %v895_v21, %v894_v19  ;;  %v387_v23 = vrot.slane %v230_v62, 2  ;;  %v300_v44 = vrot.slane %v1772_v32, 1 }
  0x2a   : > { %412 = vrot.lane.b32.xlu1 %v1615_v24, %s1501_s28  ;;  %396 = vrot.lane.b32.xlu0 %v358_v25, %s1501_s28  ;;  %v366_v18 = vsel %vm353_vm1, %v364_v9, %v365_v11  ;;  %v367_v25 = vrot.slane %v218_v63, 2  ;;  %v301_v45 = vrot.slane %v1796_v41, 1  ;;  %v389_v9 = vrot.slane %v1772_v32, 2 }
  0x2b   : > { %1396 = vmatprep.subr.bf16.mxu0 %v1395_v14  ;;  %1405 = vmatprep.subr.bf16.mxu1 %v1395_v14  ;;  %v388_v30 = vsel %vm353_vm1, %v385_v5, %v387_v23  ;;  %v369_v12 = vrot.slane %v1775_v33, 2 }
  0x2c   : > { %1398 = vmatpush3.bf16.msra.mxu0 %v1395_v14  ;;  %1407 = vmatpush3.bf16.msra.mxu1 %v1395_v14  ;;  %v368_v31 = vsel %vm353_vm1, %v365_v11, %v367_v25  ;;  %v302_v56 = vsel %vm264_vm0, %v300_v44, %v301_v45  ;;  %v390_v11 = vrot.slane %v1796_v41, 2 }
  0x2d   : > { %1401 = vmatprep.subr.msk.bf16.mxu0 %vm1400_vm4, %v1399_v22  ;;  %1406 = vmatprep.subr.msk.bf16.mxu1 %vm1400_vm4, %v1399_v22 }
  0x2e   : > { %460 = vrot.lane.b32.xlu1 %v1622_v26, %s1502_s29  ;;  %444 = vrot.lane.b32.xlu0 %v1625_v27, %s1502_s29 }
  0x30   : > { %1404 = vmatpush3.bf16.msk.msra.mxu0 %vm1400_vm4, %v1399_v22  ;;  %1408 = vmatpush3.bf16.msk.msra.mxu1 %vm1400_vm4, %v1399_v22 }
  0x32   : > { %462 = vrot.lane.b32.xlu1 %v1628_v28, %s1502_s29  ;;  %446 = vrot.lane.b32.xlu0 %v1631_v29, %s1502_s29 }
  0x36   : > { %514 = vrot.lane.b32.xlu1 %v1646_v34, %s1503_s30  ;;  %498 = vrot.lane.b32.xlu0 %v272_v35, %s1503_s30 }
  0x3a   : > { %325 = vrot.lane.b32.xlu1 %v1646_v34, %s1500_s27  ;;  %309 = vrot.lane.b32.xlu0 %v272_v35, %s1500_s27 }
  0x3e   : > { %516 = vrot.lane.b32.xlu1 %v1660_v42, %s1503_s30  ;;  %500 = vrot.lane.b32.xlu0 %v274_v43, %s1503_s30 }
  0x42   : > { %567 = vrot.lane.b32.xlu1 %v1669_v46, %s1504_s4  ;;  %551 = vrot.lane.b32.xlu0 %v361_v47, %s1504_s4 }
  0x46   : > { %327 = vrot.lane.b32.xlu1 %v1660_v42, %s1500_s27  ;;  %311 = vrot.lane.b32.xlu0 %v274_v43, %s1500_s27  ;;  %v1799_v43 = vld [vmem:[%s1569_s26 + $0x50] sm:$0xff] }
  0x47   : > { %2287 = vst [vmem:[#allocation10_spill] sm:$0xff] %v1799_v43  ;;  %v281_v48 = vrot.slane %v1799_v43, 1  ;;  %v370_v13 = vrot.slane %v1799_v43, 2 }
  0x49   : > { %v371_v19 = vsel %vm353_vm1, %v369_v12, %v370_v13 }
  0x4a   : > { %414 = vrot.lane.b32.xlu1 %v1669_v46, %s1501_s28  ;;  %398 = vrot.lane.b32.xlu0 %v361_v47, %s1501_s28  ;;  %v280_v47 = vrot.slane %v1775_v33, 1 }
  0x4c   : > { %v282_v57 = vsel %vm264_vm0, %v280_v47, %v281_v48 }
  0x4e   : > { %569 = vrot.lane.b32.xlu1 %v1682_v50, %s1504_s4  ;;  %553 = vrot.lane.b32.xlu0 %v363_v51, %s1504_s4 }
  0x52   : > { %617 = vrot.lane.b32.xlu1 %v1689_v52, %s1505_s5  ;;  %601 = vrot.lane.b32.xlu0 %v1692_v53, %s1505_s5 }
  0x56   : > { %416 = vrot.lane.b32.xlu1 %v1682_v50, %s1501_s28  ;;  %400 = vrot.lane.b32.xlu0 %v363_v51, %s1501_s28 }
  0x5a   : > { %464 = vrot.lane.b32.xlu1 %v1689_v52, %s1502_s29  ;;  %448 = vrot.lane.b32.xlu0 %v1692_v53, %s1502_s29 }
  0x5e   : > { %619 = vrot.lane.b32.xlu1 %v1702_v54, %s1505_s5  ;;  %603 = vrot.lane.b32.xlu0 %v1705_v55, %s1505_s5 }
  0x62   : > { %671 = vrot.lane.b32.xlu1 %v297_v60, %s1506_s6  ;;  %655 = vrot.lane.b32.xlu0 %v277_v61, %s1506_s6 }
  0x66   : > { %466 = vrot.lane.b32.xlu1 %v1702_v54, %s1502_s29  ;;  %450 = vrot.lane.b32.xlu0 %v1705_v55, %s1502_s29 }
  0x6a   : > { %518 = vrot.lane.b32.xlu1 %v297_v60, %s1503_s30  ;;  %502 = vrot.lane.b32.xlu0 %v277_v61, %s1503_s30 }
  0x6e   : > { %673 = vrot.lane.b32.xlu1 %v299_v7, %s1506_s6  ;;  %657 = vrot.lane.b32.xlu0 %v279_v8, %s1506_s6 }
  0x72   : > { %724 = vrot.lane.b32.xlu1 %v386_v15, %s1507_s22  ;;  %708 = vrot.lane.b32.xlu0 %v366_v18, %s1507_s22 }
  0x76   : > { %329 = vrot.lane.b32.xlu1 %v297_v60, %s1500_s27  ;;  %313 = vrot.lane.b32.xlu0 %v277_v61, %s1500_s27  ;;  %v233_v60 = vld [vmem:[%s1569_s26 + $0xb8] sm:$0x3] }
  0x77   : > { %v221_v61 = vld [vmem:[%s1569_s26 + $0x58] sm:$0x3]  ;;  %v303_v1 = vrot.slane %v233_v60, 1  ;;  %v392_v44 = vrot.slane %v233_v60, 2 }
  0x78   : > { %v283_v3 = vrot.slane %v221_v61, 1 }
  0x7a   : > { %520 = vrot.lane.b32.xlu1 %v299_v7, %s1503_s30  ;;  %504 = vrot.lane.b32.xlu0 %v279_v8, %s1503_s30 }
  0x7e   : > { %571 = vrot.lane.b32.xlu1 %v386_v15, %s1504_s4  ;;  %555 = vrot.lane.b32.xlu0 %v366_v18, %s1504_s4 }
  0x82   : > { %726 = vrot.lane.b32.xlu1 %v388_v30, %s1507_s22  ;;  %710 = vrot.lane.b32.xlu0 %v368_v31, %s1507_s22 }
  0x86   : > { %331 = vrot.lane.b32.xlu1 %v299_v7, %s1500_s27  ;;  %315 = vrot.lane.b32.xlu0 %v279_v8, %s1500_s27  ;;  %v304_v7 = vsel %vm264_vm0, %v301_v45, %v303_v1  ;;  %v284_v8 = vsel %vm264_vm0, %v281_v48, %v283_v3  ;;  %v372_v45 = vrot.slane %v221_v61, 2 }
  0x8a   : > { %418 = vrot.lane.b32.xlu1 %v386_v15, %s1501_s28  ;;  %402 = vrot.lane.b32.xlu0 %v366_v18, %s1501_s28  ;;  %v391_v18 = vsel %vm353_vm1, %v389_v9, %v390_v11 }
  0x8e   : > { %573 = vrot.lane.b32.xlu1 %v388_v30, %s1504_s4  ;;  %557 = vrot.lane.b32.xlu0 %v368_v31, %s1504_s4 }
  0x90   : > { %v1777_v35 = vpop.permute.xlu1 %307  ;;  %v1779_v36 = vpop.permute.xlu0 %305 }
  0x92   : > { %621 = vrot.lane.b32.xlu1 %v1772_v32, %s1505_s5  ;;  %605 = vrot.lane.b32.xlu0 %v1775_v33, %s1505_s5 }
  0x94   : > { %v1785_v37 = vpop.permute.xlu1 %323  ;;  %v1787_v38 = vpop.permute.xlu0 %321 }
  0x96   : > { %420 = vrot.lane.b32.xlu1 %v388_v30, %s1501_s28  ;;  %404 = vrot.lane.b32.xlu0 %v368_v31, %s1501_s28 }
  0x98   : > { %v1791_v39 = vpop.permute.xlu1 %410  ;;  %v1793_v40 = vpop.permute.xlu0 %394 }
  0x9a   : > { %468 = vrot.lane.b32.xlu1 %v1772_v32, %s1502_s29  ;;  %452 = vrot.lane.b32.xlu0 %v1775_v33, %s1502_s29 }
  0x9c   : > { %v1809_v49 = vpop.permute.xlu1 %412  ;;  %v1811_v51 = vpop.permute.xlu0 %396 }
  0x9e   : > { %623 = vrot.lane.b32.xlu1 %v1796_v41, %s1505_s5  ;;  %607 = vrot.lane.b32.xlu0 %v1799_v43, %s1505_s5 }
  0xa0   : > { %v1819_v58 = vpop.permute.xlu1 %460  ;;  %v1821_v59 = vpop.permute.xlu0 %444 }
  0xa2   : > { %675 = vrot.lane.b32.xlu1 %v302_v56, %s1506_s6  ;;  %659 = vrot.lane.b32.xlu0 %v282_v57, %s1506_s6 }
  0xa4   : > { %v1827_v62 = vpop.permute.xlu1 %462  ;;  %v1829_v63 = vpop.permute.xlu0 %446 }
  0xa6   : > { %470 = vrot.lane.b32.xlu1 %v1796_v41, %s1502_s29  ;;  %454 = vrot.lane.b32.xlu0 %v1799_v43, %s1502_s29  ;;  %v1911_v41 = vld [vmem:[%s1569_s26 + $0xc8] sm:$0xff] }
  0xa7   : > { %v494_v46 = vrot.slane %v1911_v41, 1 }
  0xa8   : > { %v1835_v4 = vpop.permute.xlu1 %514  ;;  %v1837_v5 = vpop.permute.xlu0 %498 }
  0xaa   : > { %522 = vrot.lane.b32.xlu1 %v302_v56, %s1503_s30  ;;  %506 = vrot.lane.b32.xlu0 %v282_v57, %s1503_s30 }
  0xac   : > { %v326_v14 = vpop.permute.xlu1 %325  ;;  %v310_v15 = vpop.permute.xlu0 %309 }
  0xad   : > { %v767_v33 = vsel %vm756_vm5, %v1622_v26, %v326_v14  ;;  %v759_v32 = vsel %vm756_vm5, %v1625_v27, %v310_v15 }
  0xae   : > { %677 = vrot.lane.b32.xlu1 %v304_v7, %s1506_s6  ;;  %661 = vrot.lane.b32.xlu0 %v284_v8, %s1506_s6 }
  0xb0   : > { %v1851_v21 = vpop.permute.xlu1 %516  ;;  %v1853_v22 = vpop.permute.xlu0 %500 }
  0xb2   : > { %728 = vrot.lane.b32.xlu1 %v391_v18, %s1507_s22  ;;  %712 = vrot.lane.b32.xlu0 %v371_v19, %s1507_s22 }
  0xb4   : > { %v1857_v23 = vpop.permute.xlu1 %567  ;;  %v1859_v25 = vpop.permute.xlu0 %551 }
  0xb6   : > { %333 = vrot.lane.b32.xlu1 %v302_v56, %s1500_s27  ;;  %317 = vrot.lane.b32.xlu0 %v282_v57, %s1500_s27  ;;  %v393_v56 = vsel %vm353_vm1, %v390_v11, %v392_v44  ;;  %v373_v57 = vsel %vm353_vm1, %v370_v13, %v372_v45  ;;  %v1894_v44 = vld [vmem:[%s1569_s26 + $0xc0] sm:$0xff] }
  0xb7   : > { %v493_v50 = vrot.slane %v1894_v44, 1 }
  0xb8   : > { %v1863_v30 = vpop.permute.xlu1 %327  ;;  %v1865_v31 = vpop.permute.xlu0 %311 }
  0xba   : > { %524 = vrot.lane.b32.xlu1 %v304_v7, %s1503_s30  ;;  %508 = vrot.lane.b32.xlu0 %v284_v8, %s1503_s30 }
  0xbc   : > { %v415_v47 = vpop.permute.xlu1 %414  ;;  %v399_v48 = vpop.permute.xlu0 %398 }
  0xbe   : > { %575 = vrot.lane.b32.xlu1 %v391_v18, %s1504_s4  ;;  %559 = vrot.lane.b32.xlu0 %v371_v19, %s1504_s4 }
  0xc0   : > { %v1873_v1 = vpop.permute.xlu1 %569  ;;  %v1875_v3 = vpop.permute.xlu0 %553 }
  0xc2   : > { %730 = vrot.lane.b32.xlu1 %v393_v56, %s1507_s22  ;;  %714 = vrot.lane.b32.xlu0 %v373_v57, %s1507_s22 }
  0xc4   : > { %v1879_v60 = vpop.permute.xlu1 %617  ;;  %v1881_v61 = vpop.permute.xlu0 %601 }
  0xc6   : > { %335 = vrot.lane.b32.xlu1 %v304_v7, %s1500_s27  ;;  %319 = vrot.lane.b32.xlu0 %v284_v8, %s1500_s27 }
  0xc8   : > { %v1885_v9 = vpop.permute.xlu1 %416  ;;  %v1887_v11 = vpop.permute.xlu0 %400 }
  0xca   : > { %422 = vrot.lane.b32.xlu1 %v391_v18, %s1501_s28  ;;  %406 = vrot.lane.b32.xlu0 %v371_v19, %s1501_s28 }
  0xcc   : > { %v465_v12 = vpop.permute.xlu1 %464  ;;  %v449_v13 = vpop.permute.xlu0 %448 }
  0xce   : > { %577 = vrot.lane.b32.xlu1 %v393_v56, %s1504_s4  ;;  %561 = vrot.lane.b32.xlu0 %v373_v57, %s1504_s4 }
  0xd0   : > { %v1896_v7 = vpop.permute.xlu1 %619  ;;  %v1898_v8 = vpop.permute.xlu0 %603 }
  0xd2   : > { %625 = vrot.lane.b32.xlu1 %v1894_v44, %s1505_s5  ;;  %609 = vrot.lane.b32.xlu0 %v1586_v10, %s1505_s5 }
  0xd4   : > { %v672_v18 = vpop.permute.xlu1 %671  ;;  %v656_v19 = vpop.permute.xlu0 %655 }
  0xd6   : > { %424 = vrot.lane.b32.xlu1 %v393_v56, %s1501_s28  ;;  %408 = vrot.lane.b32.xlu0 %v373_v57, %s1501_s28  ;;  %v784_v56 = vsel %vm773_vm6, %v767_v33, %v415_v47  ;;  %v776_v57 = vsel %vm773_vm6, %v759_v32, %v399_v48  ;;  %v757_v32 = vsel %vm756_vm5, %v1576_v2, %v1779_v36 }
  0xd7   : > { %v801_v14 = vsel %vm790_vm7, %v784_v56, %v465_v12  ;;  %v793_v42 = vsel %vm790_vm7, %v776_v57, %v449_v13  ;;  %v765_v33 = vsel %vm756_vm5, %v1586_v10, %v1787_v38  ;;  %v495_v48 = vsel %vm264_vm0, %v493_v50, %v494_v46 }
  0xd8   : > { %v1906_v45 = vpop.permute.xlu1 %466  ;;  %v1908_v43 = vpop.permute.xlu0 %450  ;;  %v782_v47 = vsel %vm773_vm6, %v765_v33, %v1791_v39  ;;  %v547_v33 = vrot.slane %v1911_v41, 2 }
  0xd9   : > { %v799_v2 = vsel %vm790_vm7, %v782_v47, %v1819_v58 }
  0xda   : > { %472 = vrot.lane.b32.xlu1 %v1894_v44, %s1502_s29  ;;  %456 = vrot.lane.b32.xlu0 %v1586_v10, %s1502_s29  ;;  %v816_v12 = vsel %vm807_vm8, %v799_v2, %v1835_v4 }
  0xdb   : > { %v833_v50 = vsel %vm824_vm9, %v816_v12, %v1857_v23 }
  0xdc   : > { %v519_v27 = vpop.permute.xlu1 %518  ;;  %v503_v15 = vpop.permute.xlu0 %502  ;;  %v850_v58 = vsel %vm841_vm10, %v833_v50, %v1879_v60 }
  0xdd   : > { %v1928_v34 = vsel %vm807_vm8, %v801_v14, %v519_v27  ;;  %v1931_v55 = vsel %vm807_vm8, %v793_v42, %v503_v15  ;;  %v774_v42 = vsel %vm773_vm6, %v757_v32, %v1793_v40  ;;  %v867_v4 = vsel %vm858_vm11, %v850_v58, %v672_v18 }
  0xde   : > { %627 = vrot.lane.b32.xlu1 %v1911_v41, %s1505_s5  ;;  %611 = vrot.lane.b32.xlu0 %v1581_v6, %s1505_s5  ;;  %v791_v10 = vsel %vm790_vm7, %v774_v42, %v1821_v59  ;;  %v760_v14 = vsel %vm756_vm5, %v1631_v29, %v1865_v31  ;;  %v546_v27 = vrot.slane %v1894_v44, 2 }
  0xdf   : > { %v808_v39 = vsel %vm807_vm8, %v791_v10, %v1837_v5  ;;  %v777_v32 = vsel %vm773_vm6, %v760_v14, %v1887_v11 }
  0xe0   : > { %v674_v36 = vpop.permute.xlu1 %673  ;;  %v658_v38 = vpop.permute.xlu0 %657  ;;  %v825_v40 = vsel %vm824_vm9, %v808_v39, %v1859_v25  ;;  %v236_v25 = vld [vmem:[%s1569_s26 + $0xd0] sm:$0x3]  ;;  %v794_v31 = vsel %vm790_vm7, %v777_v32, %v1908_v43 }
  0xe1   : > { %v842_v59 = vsel %vm841_vm10, %v825_v40, %v1881_v61  ;;  %v496_v60 = vrot.slane %v236_v25, 1 }
  0xe2   : > { %679 = vrot.lane.b32.xlu1 %v495_v48, %s1506_s6  ;;  %663 = vrot.lane.b32.xlu0 %v1599_v17, %s1506_s6  ;;  %v859_v5 = vsel %vm858_vm11, %v842_v59, %v656_v19  ;;  %v768_v19 = vsel %vm756_vm5, %v1628_v28, %v1863_v30 }
  0xe3   : > { %v785_v15 = vsel %vm773_vm6, %v768_v19, %v1885_v9  ;;  %v497_v30 = vsel %vm264_vm0, %v494_v46, %v496_v60  ;;  %v766_v46 = vsel %vm756_vm5, %v1581_v6, %v1785_v37 }
  0xe4   : > { %v725_v23 = vpop.permute.xlu1 %724  ;;  %v709_v13 = vpop.permute.xlu0 %708  ;;  %v802_v29 = vsel %vm790_vm7, %v785_v15, %v1906_v45  ;;  %v548_v45 = vsel %vm353_vm1, %v546_v27, %v547_v33 }
  0xe5   : > { %v884_v56 = vsel %vm875_vm12, %v867_v4, %v725_v23  ;;  %v876_v57 = vsel %vm875_vm12, %v859_v5, %v709_v13  ;;  %v238_v5 = vld [vmem:[%s1569_s26 + $0xe0] sm:$0xff] }
  0xe6   : > { %474 = vrot.lane.b32.xlu1 %v1911_v41, %s1502_s29  ;;  %1383 = vmatprep.mubr.msk.f32.mxu1 %vm903_vm13, %v884_v56  ;;  %v783_v41 = vsel %vm773_vm6, %v766_v46, %v1809_v49  ;;  %v651_v13 = vrot.slane %v238_v5, 1  ;;  %v2288_v56 = vld [vmem:[#allocation6_spill] sm:$0xff] }
  0xe7   : > { %458 = vrot.lane.b32.xlu0 %v1581_v6, %s1502_s29  ;;  %1371 = vmatprep.mubr.msk.f32.mxu0 %vm903_vm13, %v876_v57 }
  0xe8   : > { %v330_v61 = vpop.permute.xlu1 %329  ;;  %v314_v18 = vpop.permute.xlu0 %313 }
  0xe9   : > { %v769_v12 = vsel %vm756_vm5, %v1689_v52, %v330_v61  ;;  %v237_v52 = vld [vmem:[%s1569_s26 + $0xd8] sm:$0xff] }
  0xea   : > { %526 = vrot.lane.b32.xlu1 %v495_v48, %s1503_s30  ;;  %v650_v23 = vrot.slane %v237_v52, 1 }
  0xeb   : > { %510 = vrot.lane.b32.xlu0 %v1599_v17, %s1503_s30  ;;  %v758_v17 = vsel %vm756_vm5, %v1572_v0, %v1777_v35  ;;  %v800_v0 = vsel %vm790_vm7, %v783_v41, %v1827_v62 }
  0xec   : > { %v521_v44 = vpop.permute.xlu1 %520  ;;  %v505_v47 = vpop.permute.xlu0 %504  ;;  %v775_v43 = vsel %vm773_vm6, %v758_v17, %v1811_v51  ;;  %v817_v49 = vsel %vm807_vm8, %v800_v0, %v1851_v21 }
  0xed   : > { %v1999_v9 = vsel %vm807_vm8, %v802_v29, %v521_v44  ;;  %v2002_v11 = vsel %vm807_vm8, %v794_v31, %v505_v47  ;;  %v792_v35 = vsel %vm790_vm7, %v775_v43, %v1829_v63  ;;  %v834_v42 = vsel %vm824_vm9, %v817_v49, %v1873_v1  ;;  %v2289_v29 = vld [vmem:[#allocation2_spill] sm:$0xff]  ;;  %v2290_v47 = vld [vmem:[#allocation3_spill] sm:$0xff] }
  0xee   : > { %681 = vrot.lane.b32.xlu1 %v497_v30, %s1506_s6  ;;  %v809_v51 = vsel %vm807_vm8, %v792_v35, %v1853_v22  ;;  %v851_v62 = vsel %vm841_vm10, %v834_v42, %v1896_v7  ;;  %v549_v7 = vrot.slane %v236_v25, 2 }
  0xef   : > { %665 = vrot.lane.b32.xlu0 %v1596_v16, %s1506_s6  ;;  %v826_v48 = vsel %vm824_vm9, %v809_v51, %v1875_v3  ;;  %v868_v21 = vsel %vm858_vm11, %v851_v62, %v674_v36 }
  0xf0   : > { %v2022_v6 = vpop.permute.xlu1 %571  ;;  %v2024_v37 = vpop.permute.xlu0 %555  ;;  %v843_v63 = vsel %vm841_vm10, %v826_v48, %v1898_v8  ;;  %v2292_v48 = vld [vmem:[#allocation5_spill] sm:$0xff] }
  0xf1   : > { %v860_v22 = vsel %vm858_vm11, %v843_v63, %v658_v38  ;;  %v550_v38 = vsel %vm353_vm1, %v547_v33, %v549_v7  ;;  %v703_v33 = vrot.slane %v237_v52, 2 }
  0xf2   : > { %732 = vrot.lane.b32.xlu1 %v548_v45, %s1507_s22 }
  0xf3   : > { %716 = vrot.lane.b32.xlu0 %v1608_v20, %s1507_s22 }
  0xf4   : > { %v727_v2 = vpop.permute.xlu1 %726  ;;  %v711_v1 = vpop.permute.xlu0 %710 }
  0xf5   : > { %v885_v10 = vsel %vm875_vm12, %v868_v21, %v727_v2  ;;  %v877_v3 = vsel %vm875_vm12, %v860_v22, %v711_v1 }
  0xf6   : > { %528 = vrot.lane.b32.xlu1 %v497_v30, %s1503_s30  ;;  %1384 = vmatmul.mubr.msk.f32.vlgmr.msra.gmra.mrb[0].mxu1 %vm903_vm13, %v885_v10  ;;  %v704_v30 = vrot.slane %v238_v5, 2  ;;  %v835_v10 = vsel %vm824_vm9, %v1928_v34, %v2022_v6 }
  0xf7   : > { %512 = vrot.lane.b32.xlu0 %v1596_v16, %s1503_s30  ;;  %1372 = vmatmul.mubr.msk.f32.vlgmr.msra.gmra.mrb[0].mxu0 %vm903_vm13, %v877_v3  ;;  %v761_v16 = vsel %vm756_vm5, %v1692_v53, %v314_v18  ;;  %v827_v3 = vsel %vm824_vm9, %v1931_v55, %v2024_v37 }
  0xf8   : > { %v332_v8 = vpop.permute.xlu1 %331  ;;  %v316_v36 = vpop.permute.xlu0 %315  ;;  %v705_v17 = vsel %vm353_vm1, %v703_v33, %v704_v30 }
  0xf9   : > { %v770_v25 = vsel %vm756_vm5, %v1702_v54, %v332_v8  ;;  %v762_v57 = vsel %vm756_vm5, %v2288_v56, %v316_v36 }
  0xfa   : > { %579 = vrot.lane.b32.xlu1 %v548_v45, %s1504_s4  ;;  %v2291_v45 = vld [vmem:[#allocation4_spill] sm:$0xff] }
  0xfb   : > { %563 = vrot.lane.b32.xlu0 %v1608_v20, %s1504_s4 }
  0xfc   : > { %v419_v39 = vpop.permute.xlu1 %418  ;;  %v403_v50 = vpop.permute.xlu0 %402 }
  0xfd   : > { %v786_v40 = vsel %vm773_vm6, %v769_v12, %v419_v39  ;;  %v778_v58 = vsel %vm773_vm6, %v761_v16, %v403_v50 }
  0xfe   : > { %734 = vrot.lane.b32.xlu1 %v550_v38, %s1507_s22 }
  0xff   : > { %718 = vrot.lane.b32.xlu0 %v1615_v24, %s1507_s22 }
 0x100   : > { %v2063_v20 = vpop.permute.xlu1 %573  ;;  %v2065_v59 = vpop.permute.xlu0 %557 }
 0x102   : > { %581 = vrot.lane.b32.xlu1 %v550_v38, %s1504_s4 }
 0x103   : > { %565 = vrot.lane.b32.xlu0 %v1615_v24, %s1504_s4  ;;  %v239_v24 = vld [vmem:[%s1569_s26 + $0xe8] sm:$0x3]  ;;  %s206_s26 = sadd.s32 %s1289_s25, %s1288_s24 }
 0x104   : > { %v622_v53 = vpop.permute.xlu1 %621  ;;  %v606_v4 = vpop.permute.xlu0 %605  ;;  %v653_v14 = vrot.slane %v239_v24, 1  ;;  %v706_v46 = vrot.slane %v239_v24, 2  ;;  %s1290_s29 = sshll.u32 %s206_s26, 2 }
 0x105   : > { %v852_v7 = vsel %vm841_vm10, %v835_v10, %v622_v53  ;;  %v844_v8 = vsel %vm841_vm10, %v827_v3, %v606_v4  ;;  %v836_v4 = vsel %vm824_vm9, %v1999_v9, %v2063_v20  ;;  %v2293_v20 = vld [vmem:[#allocation7_spill] sm:$0xff] }
 0x106   : > { %629 = vrot.lane.b32.xlu1 %v237_v52, %s1505_s5  ;;  %v654_v31 = vsel %vm264_vm0, %v651_v13, %v653_v14  ;;  %v707_v0 = vsel %vm353_vm1, %v704_v30, %v706_v46 }
 0x107   : > { %613 = vrot.lane.b32.xlu0 %v1622_v26, %s1505_s5  ;;  %v652_v26 = vsel %vm264_vm0, %v650_v23, %v651_v13 }
 0x108   : > { %v421_v60 = vpop.permute.xlu1 %420  ;;  %v405_v61 = vpop.permute.xlu0 %404 }
 0x109   : > { %v787_v18 = vsel %vm773_vm6, %v770_v25, %v421_v60  ;;  %v779_v19 = vsel %vm773_vm6, %v762_v57, %v405_v61 }
 0x10a   : > { %631 = vrot.lane.b32.xlu1 %v238_v5, %s1505_s5  ;;  %v828_v5 = vsel %vm824_vm9, %v2002_v11, %v2065_v59 }
 0x10b   : > { %615 = vrot.lane.b32.xlu0 %v1628_v28, %s1505_s5  ;;  %s2217_s5 = scalar_lea.vmem %s2269_s3, %s1290_s29 }
 0x10c   : > { %v469_v27 = vpop.permute.xlu1 %468  ;;  %v453_v54 = vpop.permute.xlu0 %452 }
 0x10d   : > { %v803_v15 = vsel %vm790_vm7, %v786_v40, %v469_v27  ;;  %v795_v32 = vsel %vm790_vm7, %v778_v58, %v453_v54 }
 0x10e   : > { %683 = vrot.lane.b32.xlu1 %v652_v26, %s1506_s6 }
 0x10f   : > { %667 = vrot.lane.b32.xlu0 %v2289_v29, %s1506_s6 }
 0x110   : > { %v624_v44 = vpop.permute.xlu1 %623  ;;  %v608_v28 = vpop.permute.xlu0 %607 }
 0x111   : > { %v853_v23 = vsel %vm841_vm10, %v836_v4, %v624_v44  ;;  %v845_v13 = vsel %vm841_vm10, %v828_v5, %v608_v28 }
 0x112   : > { %685 = vrot.lane.b32.xlu1 %v654_v31, %s1506_s6 }
 0x113   : > { %669 = vrot.lane.b32.xlu0 %v2290_v47, %s1506_s6 }
 0x114   : > { %v676_v41 = vpop.permute.xlu1 %675  ;;  %v660_v43 = vpop.permute.xlu0 %659 }
 0x115   : > { %v869_v36 = vsel %vm858_vm11, %v852_v7, %v676_v41  ;;  %v861_v38 = vsel %vm858_vm11, %v844_v8, %v660_v43 }
 0x116   : > { %736 = vrot.lane.b32.xlu1 %v705_v17, %s1507_s22 }
 0x117   : > { %720 = vrot.lane.b32.xlu0 %v2291_v45, %s1507_s22 }
 0x118   : > { %v471_v35 = vpop.permute.xlu1 %470  ;;  %v455_v49 = vpop.permute.xlu0 %454 }
 0x119   : > { %v804_v51 = vsel %vm790_vm7, %v787_v18, %v471_v35  ;;  %v796_v42 = vsel %vm790_vm7, %v779_v19, %v455_v49  ;;  %v2294_v18 = vld [vmem:[#allocation8_spill] sm:$0xff] }
 0x11a   : > { %738 = vrot.lane.b32.xlu1 %v707_v0, %s1507_s22 }
 0x11b   : > { %722 = vrot.lane.b32.xlu0 %v2292_v48, %s1507_s22 }
 0x11c   : > { %v523_v62 = vpop.permute.xlu1 %522  ;;  %v507_v63 = vpop.permute.xlu0 %506 }
 0x11d   : > { %v2106_v21 = vsel %vm807_vm8, %v803_v15, %v523_v62  ;;  %v2109_v22 = vsel %vm807_vm8, %v795_v32, %v507_v63 }
 0x120   : > { %v678_v2 = vpop.permute.xlu1 %677  ;;  %v662_v1 = vpop.permute.xlu0 %661 }
 0x121   : > { %v870_v25 = vsel %vm858_vm11, %v853_v23, %v678_v2  ;;  %v862_v56 = vsel %vm858_vm11, %v845_v13, %v662_v1 }
 0x124   : > { %v729_v12 = vpop.permute.xlu1 %728  ;;  %v713_v16 = vpop.permute.xlu0 %712 }
 0x125   : > { %v886_v39 = vsel %vm875_vm12, %v869_v36, %v729_v12  ;;  %v878_v50 = vsel %vm875_vm12, %v861_v38, %v713_v16 }
 0x126   : > { %1374 = vmatprep.mubr.msk.f32.mxu0 %vm903_vm13, %v878_v50  ;;  %1386 = vmatprep.mubr.msk.f32.mxu1 %vm903_vm13, %v886_v39 }
 0x128   : > { %v334_v34 = vpop.permute.xlu1 %333  ;;  %v318_v55 = vpop.permute.xlu0 %317 }
 0x129   : > { %v771_v59 = vsel %vm756_vm5, %v2293_v20, %v334_v34  ;;  %v763_v19 = vsel %vm756_vm5, %v2294_v18, %v318_v55 }
 0x12c   : > { %v525_v6 = vpop.permute.xlu1 %524  ;;  %v509_v37 = vpop.permute.xlu0 %508 }
 0x12d   : > { %v821_v40 = vsel %vm807_vm8, %v804_v51, %v525_v6  ;;  %v813_v58 = vsel %vm807_vm8, %v796_v42, %v509_v37 }
 0x130   : > { %v576_v52 = vpop.permute.xlu1 %575  ;;  %v560_v53 = vpop.permute.xlu0 %559 }
 0x131   : > { %v837_v42 = vsel %vm824_vm9, %v2106_v21, %v576_v52  ;;  %v829_v48 = vsel %vm824_vm9, %v2109_v22, %v560_v53 }
 0x134   : > { %v731_v57 = vpop.permute.xlu1 %730  ;;  %v715_v60 = vpop.permute.xlu0 %714 }
 0x135   : > { %v887_v61 = vsel %vm875_vm12, %v870_v25, %v731_v57  ;;  %v879_v24 = vsel %vm875_vm12, %v862_v56, %v715_v60 }
 0x136   : > { %1375 = vmatmul.mubr.msk.f32.gmra.mrb[2].mxu0 %vm903_vm13, %v879_v24  ;;  %1387 = vmatmul.mubr.msk.f32.gmra.mrb[2].mxu1 %vm903_vm13, %v887_v61 }
 0x138   : > { %v2141_v9 = vpop.permute.xlu1 %335  ;;  %v2143_v11 = vpop.permute.xlu0 %319 }
 0x13c   : > { %v423_v26 = vpop.permute.xlu1 %422  ;;  %v407_v14 = vpop.permute.xlu0 %406 }
 0x13d   : > { %v788_v27 = vsel %vm773_vm6, %v771_v59, %v423_v26  ;;  %v780_v54 = vsel %vm773_vm6, %v763_v19, %v407_v14  ;;  %v2295_v59 = vld [vmem:[#allocation9_spill] sm:$0xff]  ;;  %v2296_v14 = vld [vmem:[#allocation10_spill] sm:$0xff] }
 0x13e   : > { %v772_v18 = vsel %vm756_vm5, %v2295_v59, %v2141_v9 }
 0x140   : > { %v578_v15 = vpop.permute.xlu1 %577  ;;  %v562_v32 = vpop.permute.xlu0 %561 }
 0x141   : > { %v838_v12 = vsel %vm824_vm9, %v821_v40, %v578_v15  ;;  %v830_v16 = vsel %vm824_vm9, %v813_v58, %v562_v32  ;;  %v764_v15 = vsel %vm756_vm5, %v2296_v14, %v2143_v11 }
 0x144   : > { %v626_v33 = vpop.permute.xlu1 %625  ;;  %v610_v30 = vpop.permute.xlu0 %609 }
 0x145   : > { %v854_v62 = vsel %vm841_vm10, %v837_v42, %v626_v33  ;;  %v846_v63 = vsel %vm841_vm10, %v829_v48, %v610_v30 }
 0x148   : > { %v425_v29 = vpop.permute.xlu1 %424  ;;  %v409_v31 = vpop.permute.xlu0 %408 }
 0x149   : > { %v781_v33 = vsel %vm773_vm6, %v764_v15, %v409_v31 }
 0x14c   : > { %v473_v44 = vpop.permute.xlu1 %472  ;;  %v457_v28 = vpop.permute.xlu0 %456 }
 0x14d   : > { %v805_v57 = vsel %vm790_vm7, %v788_v27, %v473_v44  ;;  %v797_v61 = vsel %vm790_vm7, %v780_v54, %v457_v28  ;;  %v789_v27 = vsel %vm773_vm6, %v772_v18, %v425_v29 }
 0x150   : > { %v628_v47 = vpop.permute.xlu1 %627  ;;  %v612_v17 = vpop.permute.xlu0 %611 }
 0x151   : > { %v855_v39 = vsel %vm841_vm10, %v838_v12, %v628_v47  ;;  %v847_v50 = vsel %vm841_vm10, %v830_v16, %v612_v17 }
 0x154   : > { %v680_v46 = vpop.permute.xlu1 %679  ;;  %v664_v41 = vpop.permute.xlu0 %663 }
 0x155   : > { %v871_v2 = vsel %vm858_vm11, %v854_v62, %v680_v46  ;;  %v863_v10 = vsel %vm858_vm11, %v846_v63, %v664_v41 }
 0x158   : > { %v475_v43 = vpop.permute.xlu1 %474 }
 0x159   : > { %v459_v45 = vpop.permute.xlu0 %458  ;;  %v806_v30 = vsel %vm790_vm7, %v789_v27, %v475_v43 }
 0x15a   : > { %v798_v47 = vsel %vm790_vm7, %v781_v33, %v459_v45 }
 0x15c   : > { %v527_v0 = vpop.permute.xlu1 %526 }
 0x15d   : > { %v511_v35 = vpop.permute.xlu0 %510  ;;  %v822_v24 = vsel %vm807_vm8, %v805_v57, %v527_v0 }
 0x15e   : > { %v814_v19 = vsel %vm807_vm8, %v797_v61, %v511_v35 }
 0x160   : > { %v682_v49 = vpop.permute.xlu1 %681 }
 0x161   : > { %v666_v51 = vpop.permute.xlu0 %665  ;;  %v872_v34 = vsel %vm858_vm11, %v855_v39, %v682_v49 }
 0x162   : > { %v864_v6 = vsel %vm858_vm11, %v847_v50, %v666_v51 }
 0x164   : > { %v733_v1 = vpop.permute.xlu1 %732 }
 0x165   : > { %v888_v3 = vsel %vm875_vm12, %v871_v2, %v733_v1  ;;  %v717_v7 = vpop.permute.xlu0 %716  ;;  %v1291_v2 = vld [vmem:[%s2268_s2] ss:$0 sm:$0xff] }
 0x166   : > { %v880_v8 = vsel %vm875_vm12, %v863_v10, %v717_v7  ;;  %1389 = vmatprep.mubr.msk.f32.mxu1 %vm903_vm13, %v888_v3 }
 0x167   : > { %1377 = vmatprep.mubr.msk.f32.mxu0 %vm903_vm13, %v880_v8 }
 0x168   : > { %v529_v21 = vpop.permute.xlu1 %528 }
 0x169   : > { %v513_v22 = vpop.permute.xlu0 %512  ;;  %v823_v17 = vsel %vm807_vm8, %v806_v30, %v529_v21 }
 0x16a   : > { %v815_v41 = vsel %vm807_vm8, %v798_v47, %v513_v22 }
 0x16c   : > { %v580_v36 = vpop.permute.xlu1 %579 }
 0x16d   : > { %v564_v38 = vpop.permute.xlu0 %563  ;;  %v839_v26 = vsel %vm824_vm9, %v822_v24, %v580_v36 }
 0x16e   : > { %v831_v32 = vsel %vm824_vm9, %v814_v19, %v564_v38 }
 0x170   : > { %v735_v55 = vpop.permute.xlu1 %734 }
 0x171   : > { %v889_v37 = vsel %vm875_vm12, %v872_v34, %v735_v55  ;;  %v719_v52 = vpop.permute.xlu0 %718 }
 0x172   : > { %v881_v53 = vsel %vm875_vm12, %v864_v6, %v719_v52  ;;  %1390 = vmatmul.mubr.msk.f32.gmra.mrb[4].mxu1 %vm903_vm13, %v889_v37 }
 0x173   : > { %1378 = vmatmul.mubr.msk.f32.gmra.mrb[4].mxu0 %vm903_vm13, %v881_v53 }
 0x174   : > { %v582_v40 = vpop.permute.xlu1 %581 }
 0x175   : > { %v566_v58 = vpop.permute.xlu0 %565  ;;  %v840_v31 = vsel %vm824_vm9, %v823_v17, %v582_v40 }
 0x176   : > { %v832_v0 = vsel %vm824_vm9, %v815_v41, %v566_v58 }
 0x178   : > { %v630_v4 = vpop.permute.xlu1 %629 }
 0x179   : > { %v614_v5 = vpop.permute.xlu0 %613  ;;  %v856_v54 = vsel %vm841_vm10, %v839_v26, %v630_v4 }
 0x17a   : > { %v848_v9 = vsel %vm841_vm10, %v831_v32, %v614_v5 }
 0x17c   : > { %v632_v23 = vpop.permute.xlu1 %631 }
 0x17d   : > { %v616_v13 = vpop.permute.xlu0 %615  ;;  %v857_v45 = vsel %vm841_vm10, %v840_v31, %v632_v23 }
 0x17e   : > { %v849_v35 = vsel %vm841_vm10, %v832_v0, %v616_v13 }
 0x180   : > { %v684_v25 = vpop.permute.xlu1 %683 }
 0x181   : > { %v668_v56 = vpop.permute.xlu0 %667  ;;  %v873_v44 = vsel %vm858_vm11, %v856_v54, %v684_v25 }
 0x182   : > { %v865_v11 = vsel %vm858_vm11, %v848_v9, %v668_v56 }
 0x184   : > { %v686_v60 = vpop.permute.xlu1 %685 }
 0x185   : > { %v670_v20 = vpop.permute.xlu0 %669  ;;  %v874_v49 = vsel %vm858_vm11, %v857_v45, %v686_v60 }
 0x186   : > { %v866_v42 = vsel %vm858_vm11, %v849_v35, %v670_v20 }
 0x188   : > { %v737_v28 = vpop.permute.xlu1 %736 }
 0x189   : > { %v890_v29 = vsel %vm875_vm12, %v873_v44, %v737_v28  ;;  %v721_v46 = vpop.permute.xlu0 %720 }
 0x18a   : > { %v882_v43 = vsel %vm875_vm12, %v865_v11, %v721_v46  ;;  %1392 = vmatprep.mubr.msk.f32.mxu1 %vm903_vm13, %v890_v29 }
 0x18b   : > { %1380 = vmatprep.mubr.msk.f32.mxu0 %vm903_vm13, %v882_v43 }
 0x18c   : > { %v739_v51 = vpop.permute.xlu1 %738 }
 0x18d   : > { %v891_v48 = vsel %vm875_vm12, %v874_v49, %v739_v51  ;;  %v723_v62 = vpop.permute.xlu0 %722 }
 0x18e   : > { %v883_v63 = vsel %vm875_vm12, %v866_v42, %v723_v62  ;;  %1393 = vmatmul.mubr.msk.f32.gmra.mrb[6].mxu1 %vm903_vm13, %v891_v48 }
 0x18f   : > { %1381 = vmatmul.mubr.msk.f32.gmra.mrb[6].mxu0 %vm903_vm13, %v883_v63 }
 0x1c9   : > { %v1385_v1 = vpop.f32.mrb[0].mxu1 }
 0x1ca   : > { %v1373_v10 = vpop.f32.mrb[0].mxu0  ;;  %v1068_v3 = vadd.f32 %v1385_v1, %v1291_v2  ;;  %v1062_v7 = vpop.f32.mrb[1].mxu1 }
 0x1cb   : > { %v1028_v8 = vadd.f32 %v1373_v10, %v1291_v2  ;;  %v1022_v21 = vpop.f32.mrb[1].mxu0  ;;  %v1063_v22 = vadd.f32 %v1291_v2, %v1062_v7 }
 0x1cc   : > { %v1336_v36 = vpack.c.bf16 %v1068_v3, %v1068_v3  ;;  %v1023_v38 = vadd.f32 %v1291_v2, %v1022_v21 }
 0x1cd   : > { %v1328_v12 = vpack.c.bf16 %v1028_v8, %v1028_v8  ;;  %v1335_v16 = vpack.c.bf16 %v1063_v22, %v1063_v22 }
 0x1ce   : > { %1175 = vst.msk [vmem:[%s2217_s5 + $0x24] sm:$0xf] %vm1165_vm14, %v1336_v36  ;;  %v1327_v39 = vpack.c.bf16 %v1023_v38, %v1023_v38 }
 0x1cf   : > { %1167 = vst.msk [vmem:[%s2217_s5 + $0x4] sm:$0xf] %vm1165_vm14, %v1328_v12  ;;  %1174 = vst.msk [vmem:[%s2217_s5 + $0x20] sm:$0xf] %vm1165_vm14, %v1335_v16 }
 0x1d0   : > { %1166 = vst.msk [vmem:[%s2217_s5] sm:$0xf] %vm1165_vm14, %v1327_v39 }
 0x209   : > { %v1376_v50 = vpop.f32.mrb[2].mxu0  ;;  %v1388_v34 = vpop.f32.mrb[2].mxu1 }
 0x20a   : > { %v1038_v55 = vadd.f32 %v1376_v50, %v1291_v2  ;;  %v1078_v6 = vadd.f32 %v1388_v34, %v1291_v2  ;;  %v1032_v37 = vpop.f32.mrb[3].mxu0  ;;  %v1072_v52 = vpop.f32.mrb[3].mxu1 }
 0x20b   : > { %v1033_v53 = vadd.f32 %v1291_v2, %v1032_v37  ;;  %v1073_v40 = vadd.f32 %v1291_v2, %v1072_v52 }
 0x20c   : > { %v1330_v58 = vpack.c.bf16 %v1038_v55, %v1038_v55  ;;  %v1338_v4 = vpack.c.bf16 %v1078_v6, %v1078_v6 }
 0x20d   : > { %v1329_v5 = vpack.c.bf16 %v1033_v53, %v1033_v53  ;;  %v1337_v23 = vpack.c.bf16 %v1073_v40, %v1073_v40 }
 0x20e   : > { %1169 = vst.msk [vmem:[%s2217_s5 + $0xc] sm:$0xf] %vm1165_vm14, %v1330_v58  ;;  %1177 = vst.msk [vmem:[%s2217_s5 + $0x2c] sm:$0xf] %vm1165_vm14, %v1338_v4 }
 0x20f   : > { %1168 = vst.msk [vmem:[%s2217_s5 + $0x8] sm:$0xf] %vm1165_vm14, %v1329_v5  ;;  %1176 = vst.msk [vmem:[%s2217_s5 + $0x28] sm:$0xf] %vm1165_vm14, %v1337_v23 }
 0x245   : > { %v1391_v13 = vpop.f32.mrb[4].mxu1 }
 0x246   : > { %v1379_v25 = vpop.f32.mrb[4].mxu0  ;;  %v1088_v56 = vadd.f32 %v1391_v13, %v1291_v2  ;;  %v1082_v57 = vpop.f32.mrb[5].mxu1 }
 0x247   : > { %v1048_v60 = vadd.f32 %v1379_v25, %v1291_v2  ;;  %v1042_v61 = vpop.f32.mrb[5].mxu0  ;;  %v1083_v24 = vadd.f32 %v1291_v2, %v1082_v57 }
 0x248   : > { %v1340_v20 = vpack.c.bf16 %v1088_v56, %v1088_v56  ;;  %v1043_v59 = vadd.f32 %v1291_v2, %v1042_v61 }
 0x249   : > { %v1332_v18 = vpack.c.bf16 %v1048_v60, %v1048_v60  ;;  %v1339_v19 = vpack.c.bf16 %v1083_v24, %v1083_v24 }
 0x24a   : > { %1179 = vst.msk [vmem:[%s2217_s5 + $0x34] sm:$0xf] %vm1165_vm14, %v1340_v20  ;;  %v1331_v26 = vpack.c.bf16 %v1043_v59, %v1043_v59 }
 0x24b   : > { %1171 = vst.msk [vmem:[%s2217_s5 + $0x14] sm:$0xf] %vm1165_vm14, %v1332_v18  ;;  %1178 = vst.msk [vmem:[%s2217_s5 + $0x30] sm:$0xf] %vm1165_vm14, %v1339_v19 }
 0x24c   : > { %1170 = vst.msk [vmem:[%s2217_s5 + $0x10] sm:$0xf] %vm1165_vm14, %v1331_v26 }
 0x261   : > { %v1394_v14 = vpop.f32.mrb[6].mxu1 }
 0x262   : > { %v1382_v15 = vpop.f32.mrb[6].mxu0  ;;  %v1098_v27 = vadd.f32 %v1394_v14, %v1291_v2  ;;  %v1092_v32 = vpop.f32.mrb[7].mxu1 }
 0x263   : > { %v1058_v54 = vadd.f32 %v1382_v15, %v1291_v2  ;;  %v1052_v33 = vpop.f32.mrb[7].mxu0  ;;  %v1093_v30 = vadd.f32 %v1291_v2, %v1092_v32 }
 0x264   : > { %v1342_v9 = vpack.c.bf16 %v1098_v27, %v1098_v27  ;;  %v1053_v44 = vadd.f32 %v1291_v2, %v1052_v33 }
 0x265   : > { %v1334_v28 = vpack.c.bf16 %v1058_v54, %v1058_v54  ;;  %v1341_v47 = vpack.c.bf16 %v1093_v30, %v1093_v30 }
 0x266   : > { %1181 = vst.msk [vmem:[%s2217_s5 + $0x3c] sm:$0xf] %vm1165_vm14, %v1342_v9  ;;  %v1333_v17 = vpack.c.bf16 %v1053_v44, %v1053_v44 }
 0x267   : > { %1173 = vst.msk [vmem:[%s2217_s5 + $0x1c] sm:$0xf] %vm1165_vm14, %v1334_v28  ;;  %1180 = vst.msk [vmem:[%s2217_s5 + $0x38] sm:$0xf] %vm1165_vm14, %v1341_v47 }
 0x268   : > { %1172 = vst.msk [vmem:[%s2217_s5 + $0x18] sm:$0xf] %vm1165_vm14, %v1333_v17 }
 0x269 PF: > { %s13_s16 = sadd.s32 1, %s1498_s16   ;;  %s2297_s12 = smov %s1490_s14 }
 0x26a   : > { %p10_p8 = scmp.ge.s32.totalorder %s13_s16, 6   ;;  %s2298_s13 = smov %s1494_s15 }
 0x26b   : > { %s2299_s14 = smov %s2302_s17  ;;  %s2300_s15 = smov %s2306_s18 }
 0x26c   :  { %12 = sbr.rel (!%p10_p8) target bundleno = 3 (0x3), region = 62 }

// kernel: classifier_forward.3
= control target key start
LH: loop header
LB: loop body
LE: loop exit
PB: predicated region body
PF: predicated region fallthrough
CT: control target
= control target key end

     0   :  { %s1527_s12 = smov 0   ;;  %s1529_s13 = smov 0   ;;  %s1668_s0 = inlined_call_operand.vmem [shape: bf16[2,16384], index: 0, kind: input, shape index: {}]   ;;  %s1669_s1 = inlined_call_operand.vmem [shape: bf16[4,16384], index: 1, kind: input, shape index: {}]   ;;  %s1670_s2 = inlined_call_operand.vmem [shape: f32[1,4], index: 2, kind: input, shape index: {}]   ;;  %s1671_s3 = inlined_call_operand.vmem [shape: f32[2,2,4], index: 3, kind: output, shape index: {}]  }
   0x1   :  { %s1531_s14 = smov 0   ;;  %s1533_s15 = smov 0  }
   0x2   :  { %s1535_s16 = smov 0  }
   0x3 LB: > { %s22_s17 = sadd.s32 1, %s1494_s14  ;;  %s25_s18 = sadd.s32 1, %s1498_s15  ;;  %s1502_s16 = sphi %s1535_s16, %s13_s16   ;;  %s1498_s15 = sphi %s1533_s15, %s1676_s15   ;;  %s1494_s14 = sphi %s1531_s14, %s1675_s14   ;;  %s1490_s13 = sphi %s1529_s13, %s1674_s13   ;;  %s1486_s12 = sphi %s1527_s12, %s1673_s12  }
   0x4   : > { %p23_p0 = scmp.ge.s32.totalorder %s22_s17, 2  ;;  %p1398_p1 = scmp.ge.s32.totalorder %s1502_s16, 1 }
   0x5   : > { %p176_p2 = scmp.lt.s32.totalorder %s1502_s16, 5 }
   0x6   : > { %s1678_s17 = smov (%p23_p0, %s22_s17), 0  ;;  %s1680_s18 = smov (!%p23_p0, %s25_s18), %s1498_s15 }
   0x7   : > { %p177_p3 = pnand %p1398_p1, %p176_p2  ;;  %p27_p4 = scmp.ge.s32.totalorder %s1680_s18, 2 }
   0x8   : > { %s1399_s19 = sshll.u32 (!%p177_p3), %s1490_s13, 1  ;;  %p226_p5 = scmp.lt.s32.totalorder (!%p177_p3), %s1490_s13, 1 }
   0x9   : > { %s1682_s18 = smov (%p27_p4, %s1680_s18), 0  ;;  %180 = sbr.rel (%p177_p3) target bundleno = 328 (0x148), region = 32 }
   0xa   : > { %s208_s20 = sadd.s32 (!%p177_p3), %s1486_s12, %s1399_s19  ;;  %p1405_p7 = scmp.ne.s32.totalorder (!%p177_p3), %s1486_s12, 0 }
   0xb   : > { %s1400_s21 = sshll.u32 (!%p177_p3), %s208_s20, 5 }
   0xc   : > { %p210_p6 = scmp.lt.s32.totalorder (!%p177_p3), %s1400_s21, 127 }
  0x10   : > { %s227_s22 = scalar_select %p226_p5, %s1490_s13, 1 }
  0x11   : > { %s1684_s21 = smov (!%p210_p6, %s1400_s21), 127  ;;  %234 = sbr.rel (%p1405_p7) target bundleno = 24 (0x18), region = 36 }
  0x12   : > { %s1404_s23 = sshll.u32 %s227_s22, 1  ;;  %s1568_s26 = scalar_lea.vmem %s1668_s0, %s1684_s21  ;;  %vm235_vm0 = vcmask (!%p1405_p7), 25600   ;;  %v1504_v0 = vmov (!%p1405_p7), 0.0  }
  0x13   : > { %s1403_s27 = sshll.u32 %s1684_s21, 1  ;;  %s1578_s6 = scalar_lea.vmem %s1671_s3, %s1404_s23 }
  0x14   : > { %s1573_s30 = scalar_lea.vmem %s1669_s1, %s1403_s27  ;;  %236 = vst.msk [vmem:[%s1578_s6] sm:$0x3] (!%p1405_p7), %vm235_vm0, %v1504_v0 }
  0x18 PF: > { %v242_v1 = vld [vmem:[%s1573_s30] sm:$0xff]  ;;  %v258_v2 = vlaneseq  ;;  %v1505_v3 = vmov 1966171168   ;;  %v1506_v5 = vmov 1983009808   ;;  %v243_v7 = vld [vmem:[%s1573_s30 + $0x8] sm:$0xff] }
  0x19   : > { %v256_v4 = vunpack.c.l.s4 %v1505_v3  ;;  %v492_v6 = vunpack.c.l.s4 %v1506_v5  ;;  %v490_v11 = vcombine.high %v242_v1, %v242_v1  ;;  %v238_v12 = vld [vmem:[%s1568_s26] sm:$0xff]  ;;  %v507_v14 = vcombine.high %v243_v7, %v243_v7  ;;  %v244_v21 = vld [vmem:[%s1573_s30 + $0x10] sm:$0xff]  ;;  %v239_v31 = vld [vmem:[%s1568_s26 + $0x8] sm:$0xff]  ;;  %p1301_p8 = scmp.eq.s32.totalorder %s1486_s12, 1  ;;  %p1302_p9 = scmp.eq.s32.totalorder %s1490_s13, 0 }
  0x1a   : > { %v259_v8 = vshrl.u32 %v258_v2, 7  ;;  %v254_v13 = vcombine.high %v238_v12, %v238_v12  ;;  %v524_v30 = vcombine.high %v244_v21, %v244_v21  ;;  %v245_v40 = vld [vmem:[%s1573_s30 + $0x18] sm:$0xff]  ;;  %v303_v43 = vcombine.high %v239_v31, %v239_v31  ;;  %v246_v53 = vld [vmem:[%s1573_s30 + $0x20] sm:$0xff]  ;;  %v240_v59 = vld [vmem:[%s1568_s26 + $0x10] sm:$0xff] }
  0x1b   : > { %v257_v9 = vunpack.c.0.s8 %v256_v4  ;;  %v493_v10 = vunpack.c.0.s8 %v492_v6  ;;  %v541_v46 = vcombine.high %v245_v40, %v245_v40  ;;  %v558_v58 = vcombine.high %v246_v53, %v246_v53  ;;  %v247_v2 = vld [vmem:[%s1573_s30 + $0x28] sm:$0xff]  ;;  %p1640_p10 = pnand %p1302_p9, %p1301_p8 }
  0x1c   : > { %v352_v5 = vcombine.high %v240_v59, %v240_v59  ;;  %vm1299_vm1 = vcmask 25600  }
  0x1d   : > { %v1585_v15 = vsub.s32 %v257_v9, %v259_v8  ;;  %v1587_v16 = vsub.s32 %v493_v10, %v259_v8  ;;  %v575_v8 = vcombine.high %v247_v2, %v247_v2 }
  0x1f   : > { %v497_v17 = vrot.slane %v242_v1, %v1587_v16  ;;  %v504_v18 = vrot.slane %v490_v11, %v1587_v16  ;;  %v261_v19 = vrot.slane %v238_v12, %v1585_v15  ;;  %v514_v20 = vrot.slane %v243_v7, %v1587_v16 }
  0x20   : > { %v521_v22 = vrot.slane %v507_v14, %v1587_v16  ;;  %v268_v23 = vrot.slane %v254_v13, %v1585_v15  ;;  %v310_v36 = vrot.slane %v239_v31, %v1585_v15  ;;  %v531_v37 = vrot.slane %v244_v21, %v1587_v16 }
  0x21   : > { %v505_v24 = vcombine.high %v497_v17, %v497_v17  ;;  %v506_v25 = vcombine.high %v504_v18, %v504_v18  ;;  %v269_v26 = vcombine.high %v261_v19, %v261_v19  ;;  %v522_v27 = vcombine.high %v514_v20, %v514_v20 }
  0x22   : > { %v523_v28 = vcombine.high %v521_v22, %v521_v22  ;;  %v270_v29 = vcombine.high %v268_v23, %v268_v23  ;;  %v277_v33 = vrot.slane %v261_v19, %v1585_v15  ;;  %v538_v38 = vrot.slane %v524_v30, %v1587_v16  ;;  %v249_v30 = vld [vmem:[%s1573_s30 + $0x38] sm:$0xff] }
  0x23   : > { %658 = vmatprep.subr.bf16.mxu0 %v505_v24  ;;  %698 = vmatprep.subr.bf16.mxu1 %v506_v25  ;;  %v291_v32 = vrot.slane %v269_v26, %v1585_v15  ;;  %v318_v42 = vcombine.high %v310_v36, %v310_v36  ;;  %v539_v44 = vcombine.high %v531_v37, %v531_v37 }
  0x24   : > { %659 = vmatpush1.bf16.xpose.msra.mxu0 %v497_v17  ;;  %699 = vmatpush1.bf16.xpose.msra.mxu1 %v504_v18  ;;  %v298_v35 = vrot.slane %v270_v29, %v1585_v15  ;;  %v299_v39 = vcombine.high %v277_v33, %v277_v33  ;;  %v540_v45 = vcombine.high %v538_v38, %v538_v38  ;;  %v248_v17 = vld [vmem:[%s1573_s30 + $0x30] sm:$0xff] }
  0x25   : > { %690 = vmatprep.mubr.bf16.mxu0 %v291_v32  ;;  %v301_v34 = vcombine.high %v291_v32, %v291_v32  ;;  %738 = vmatprep.subr.bf16.mxu0 %v522_v27  ;;  %v284_v47 = vrot.slane %v268_v23, %v1585_v15  ;;  %v340_v48 = vrot.slane %v318_v42, %v1585_v15  ;;  %v241_v23 = vld [vmem:[%s1568_s26 + $0x18] sm:$0xff] }
  0x26   : > { %778 = vmatprep.subr.bf16.mxu1 %v523_v28  ;;  %v302_v41 = vcombine.high %v298_v35, %v298_v35  ;;  %v317_v49 = vrot.slane %v303_v43, %v1585_v15  ;;  %v548_v50 = vrot.slane %v245_v40, %v1587_v16  ;;  %v555_v51 = vrot.slane %v541_v46, %v1587_v16 }
  0x27   : > { %730 = vmatprep.mubr.bf16.mxu1 %v301_v34  ;;  %v300_v52 = vcombine.high %v284_v47, %v284_v47  ;;  %v350_v54 = vcombine.high %v340_v48, %v340_v48  ;;  %v326_v60 = vrot.slane %v310_v36, %v1585_v15  ;;  %v359_v62 = vrot.slane %v240_v59, %v1585_v15 }
  0x28   : > { %v319_v55 = vcombine.high %v317_v49, %v317_v49  ;;  %v556_v56 = vcombine.high %v548_v50, %v548_v50  ;;  %v557_v57 = vcombine.high %v555_v51, %v555_v51  ;;  %v565_v63 = vrot.slane %v246_v53, %v1587_v16 }
  0x29   : > { %v572_v0 = vrot.slane %v558_v58, %v1587_v16  ;;  %v348_v1 = vcombine.high %v326_v60, %v326_v60  ;;  %v367_v4 = vcombine.high %v359_v62, %v359_v62  ;;  %v333_v9 = vrot.slane %v317_v49, %v1585_v15 }
  0x2a   : > { %v347_v61 = vrot.slane %v319_v55, %v1585_v15  ;;  %v573_v6 = vcombine.high %v565_v63, %v565_v63  ;;  %v366_v11 = vrot.slane %v352_v5, %v1585_v15  ;;  %v582_v12 = vrot.slane %v247_v2, %v1587_v16 }
  0x2b   : > { %691 = vmatmul.mubr.bf16.vlgmr.msra.gmra.mrb[0].mxu0 %v277_v33  ;;  %731 = vmatmul.mubr.bf16.vlgmr.msra.gmra.mrb[0].mxu1 %v299_v39  ;;  %v574_v7 = vcombine.high %v572_v0, %v572_v0  ;;  %v389_v10 = vrot.slane %v367_v4, %v1585_v15  ;;  %v589_v13 = vrot.slane %v575_v8, %v1587_v16 }
  0x2c   : > { %739 = vmatpush1.bf16.xpose.msra.mxu0 %v514_v20  ;;  %779 = vmatpush1.bf16.xpose.msra.mxu1 %v521_v22  ;;  %v351_v3 = vcombine.high %v347_v61, %v347_v61  ;;  %v349_v14 = vcombine.high %v333_v9, %v333_v9  ;;  %v368_v19 = vcombine.high %v366_v11, %v366_v11 }
  0x2d   : > { %770 = vmatprep.mubr.bf16.mxu0 %v298_v35  ;;  %810 = vmatprep.mubr.bf16.mxu1 %v302_v41  ;;  %v399_v18 = vcombine.high %v389_v10, %v389_v10  ;;  %v590_v20 = vcombine.high %v582_v12, %v582_v12  ;;  %v591_v21 = vcombine.high %v589_v13, %v589_v13 }
  0x2e   : > { %818 = vmatprep.subr.bf16.mxu0 %v539_v44  ;;  %858 = vmatprep.subr.bf16.mxu1 %v540_v45  ;;  %v592_v22 = vcombine.high %v248_v17, %v248_v17  ;;  %v375_v24 = vrot.slane %v359_v62, %v1585_v15  ;;  %v396_v25 = vrot.slane %v368_v19, %v1585_v15 }
  0x2f   : > { %v408_v26 = vrot.slane %v241_v23, %v1585_v15  ;;  %v599_v27 = vrot.slane %v248_v17, %v1587_v16  ;;  %v401_v33 = vcombine.high %v241_v23, %v241_v23  ;;  %v609_v36 = vcombine.high %v249_v30, %v249_v30 }
  0x30   : > { %v606_v28 = vrot.slane %v592_v22, %v1587_v16  ;;  %v397_v29 = vcombine.high %v375_v24, %v375_v24  ;;  %v400_v31 = vcombine.high %v396_v25, %v396_v25  ;;  %v616_v40 = vrot.slane %v249_v30, %v1587_v16 }
  0x31   : > { %v416_v32 = vcombine.high %v408_v26, %v408_v26  ;;  %v607_v34 = vcombine.high %v599_v27, %v599_v27  ;;  %v415_v39 = vrot.slane %v401_v33, %v1585_v15  ;;  %v623_v41 = vrot.slane %v609_v36, %v1587_v16 }
  0x32   : > { %v608_v35 = vcombine.high %v606_v28, %v606_v28  ;;  %v624_v45 = vcombine.high %v616_v40, %v616_v40 }
  0x33   : > { %771 = vmatmul.mubr.bf16.vlgmr.msra.gmra.mrb[4].mxu0 %v284_v47  ;;  %811 = vmatmul.mubr.bf16.vlgmr.msra.gmra.mrb[4].mxu1 %v300_v52  ;;  %v417_v44 = vcombine.high %v415_v39, %v415_v39  ;;  %v625_v46 = vcombine.high %v623_v41, %v623_v41  ;;  %v424_v47 = vrot.slane %v408_v26, %v1585_v15 }
  0x34   : > { %819 = vmatpush1.bf16.xpose.msra.mxu0 %v531_v37  ;;  %859 = vmatpush1.bf16.xpose.msra.mxu1 %v538_v38  ;;  %v382_v37 = vrot.slane %v366_v11, %v1585_v15  ;;  %v438_v38 = vrot.slane %v416_v32, %v1585_v15 }
  0x35   : > { %850 = vmatprep.mubr.bf16.mxu0 %v340_v48  ;;  %890 = vmatprep.mubr.bf16.mxu1 %v350_v54  ;;  %v445_v48 = vrot.slane %v417_v44, %v1585_v15  ;;  %v446_v16 = vcombine.high %v424_v47, %v424_v47 }
  0x36   : > { %898 = vmatprep.subr.bf16.mxu0 %v556_v56  ;;  %938 = vmatprep.subr.bf16.mxu1 %v557_v57  ;;  %v398_v42 = vcombine.high %v382_v37, %v382_v37  ;;  %v448_v43 = vcombine.high %v438_v38, %v438_v38 }
  0x37   : > { %v449_v49 = vcombine.high %v445_v48, %v445_v48 }
  0x3b   : > { %851 = vmatmul.mubr.bf16.vlgmr.msra.gmra.mrb[8].mxu0 %v326_v60  ;;  %891 = vmatmul.mubr.bf16.vlgmr.msra.gmra.mrb[8].mxu1 %v348_v1 }
  0x3c   : > { %899 = vmatpush1.bf16.xpose.msra.mxu0 %v548_v50  ;;  %939 = vmatpush1.bf16.xpose.msra.mxu1 %v555_v51  ;;  %v431_v50 = vrot.slane %v415_v39, %v1585_v15 }
  0x3d   : > { %930 = vmatprep.mubr.bf16.mxu0 %v347_v61  ;;  %970 = vmatprep.mubr.bf16.mxu1 %v351_v3 }
  0x3e   : > { %978 = vmatprep.subr.bf16.mxu0 %v573_v6  ;;  %1018 = vmatprep.subr.bf16.mxu1 %v574_v7  ;;  %v447_v51 = vcombine.high %v431_v50, %v431_v50 }
  0x43   : > { %931 = vmatmul.mubr.bf16.vlgmr.msra.gmra.mrb[12].mxu0 %v333_v9  ;;  %971 = vmatmul.mubr.bf16.vlgmr.msra.gmra.mrb[12].mxu1 %v349_v14 }
  0x44   : > { %979 = vmatpush1.bf16.xpose.msra.mxu0 %v565_v63  ;;  %1019 = vmatpush1.bf16.xpose.msra.mxu1 %v572_v0 }
  0x45   : > { %1010 = vmatprep.mubr.bf16.mxu0 %v389_v10  ;;  %1050 = vmatprep.mubr.bf16.mxu1 %v399_v18 }
  0x46   : > { %1058 = vmatprep.subr.bf16.mxu0 %v590_v20  ;;  %1098 = vmatprep.subr.bf16.mxu1 %v591_v21 }
  0x4b   : > { %1011 = vmatmul.mubr.bf16.vlgmr.msra.gmra.mrb[16].mxu0 %v375_v24  ;;  %1051 = vmatmul.mubr.bf16.vlgmr.msra.gmra.mrb[16].mxu1 %v397_v29 }
  0x4c   : > { %1059 = vmatpush1.bf16.xpose.msra.mxu0 %v582_v12  ;;  %1099 = vmatpush1.bf16.xpose.msra.mxu1 %v589_v13 }
  0x4d   : > { %1090 = vmatprep.mubr.bf16.mxu0 %v396_v25  ;;  %1130 = vmatprep.mubr.bf16.mxu1 %v400_v31 }
  0x4e   : > { %1138 = vmatprep.subr.bf16.mxu0 %v607_v34  ;;  %1178 = vmatprep.subr.bf16.mxu1 %v608_v35 }
  0x53   : > { %1091 = vmatmul.mubr.bf16.vlgmr.msra.gmra.mrb[20].mxu0 %v382_v37  ;;  %1131 = vmatmul.mubr.bf16.vlgmr.msra.gmra.mrb[20].mxu1 %v398_v42 }
  0x54   : > { %1139 = vmatpush1.bf16.xpose.msra.mxu0 %v599_v27  ;;  %1179 = vmatpush1.bf16.xpose.msra.mxu1 %v606_v28 }
  0x55   : > { %1170 = vmatprep.mubr.bf16.mxu0 %v438_v38  ;;  %1210 = vmatprep.mubr.bf16.mxu1 %v448_v43 }
  0x56   : > { %1218 = vmatprep.subr.bf16.mxu0 %v624_v45  ;;  %1258 = vmatprep.subr.bf16.mxu1 %v625_v46 }
  0x5b   : > { %1171 = vmatmul.mubr.bf16.vlgmr.msra.gmra.mrb[24].mxu0 %v424_v47  ;;  %1211 = vmatmul.mubr.bf16.vlgmr.msra.gmra.mrb[24].mxu1 %v446_v16 }
  0x5c   : > { %1219 = vmatpush1.bf16.xpose.msra.mxu0 %v616_v40  ;;  %1259 = vmatpush1.bf16.xpose.msra.mxu1 %v623_v41 }
  0x5d   : > { %1250 = vmatprep.mubr.bf16.mxu0 %v445_v48  ;;  %1290 = vmatprep.mubr.bf16.mxu1 %v449_v49 }
  0x63   : > { %1251 = vmatmul.mubr.bf16.vlgmr.msra.gmra.mrb[28].mxu0 %v431_v50  ;;  %1291 = vmatmul.mubr.bf16.vlgmr.msra.gmra.mrb[28].mxu1 %v447_v51 }
  0xfe   : > { %v692_v52 = vpop.f32.mrb[0].mxu0  ;;  %v732_v53 = vpop.f32.mrb[0].mxu1 }
  0xff   : > { %v733_v54 = vadd.f32 %v732_v53, %v692_v52  ;;  %v694_v55 = vpop.f32.mrb[1].mxu0  ;;  %v734_v56 = vpop.f32.mrb[1].mxu1 }
 0x100   : > { %v695_v57 = vpop.f32.mrb[2].mxu0  ;;  %v735_v15 = vpop.f32.mrb[2].mxu1 }
 0x101   : > { %v696_v58 = vpop.f32.mrb[3].mxu0  ;;  %v736_v59 = vpop.f32.mrb[3].mxu1 }
 0x106   : > { %v772_v60 = vpop.f32.mrb[4].mxu0  ;;  %v812_v61 = vpop.f32.mrb[4].mxu1 }
 0x107   : > { %v773_v62 = vadd.f32 %v772_v60, %v733_v54  ;;  %v774_v63 = vpop.f32.mrb[5].mxu0  ;;  %v814_v0 = vpop.f32.mrb[5].mxu1 }
 0x108   : > { %v775_v1 = vpop.f32.mrb[6].mxu0  ;;  %v815_v2 = vpop.f32.mrb[6].mxu1 }
 0x109   : > { %v813_v3 = vadd.f32 %v812_v61, %v773_v62  ;;  %v776_v4 = vpop.f32.mrb[7].mxu0  ;;  %v816_v5 = vpop.f32.mrb[7].mxu1  ;;  %v237_v61 = vld [vmem:[%s1578_s6] sm:$0x3] }
 0x10a   : > { %v1406_v5 = vld [vmem:[%s1670_s2] ss:$0 sm:$0xff] (!%p1640_p10) }
 0x10e   : > { %v852_v6 = vpop.f32.mrb[8].mxu0  ;;  %v892_v7 = vpop.f32.mrb[8].mxu1 }
 0x10f   : > { %v853_v8 = vadd.f32 %v852_v6, %v813_v3  ;;  %v854_v9 = vpop.f32.mrb[9].mxu0  ;;  %v894_v10 = vpop.f32.mrb[9].mxu1 }
 0x110   : > { %v855_v11 = vpop.f32.mrb[10].mxu0  ;;  %v895_v12 = vpop.f32.mrb[10].mxu1 }
 0x111   : > { %v893_v13 = vadd.f32 %v892_v7, %v853_v8  ;;  %v856_v14 = vpop.f32.mrb[11].mxu0  ;;  %v896_v17 = vpop.f32.mrb[11].mxu1 }
 0x116   : > { %v932_v18 = vpop.f32.mrb[12].mxu0  ;;  %v972_v19 = vpop.f32.mrb[12].mxu1 }
 0x117   : > { %v933_v20 = vadd.f32 %v932_v18, %v893_v13  ;;  %v934_v21 = vpop.f32.mrb[13].mxu0  ;;  %v974_v22 = vpop.f32.mrb[13].mxu1 }
 0x118   : > { %v935_v23 = vpop.f32.mrb[14].mxu0  ;;  %v975_v24 = vpop.f32.mrb[14].mxu1 }
 0x119   : > { %v973_v25 = vadd.f32 %v972_v19, %v933_v20  ;;  %v936_v26 = vpop.f32.mrb[15].mxu0  ;;  %v976_v27 = vpop.f32.mrb[15].mxu1 }
 0x11e   : > { %v1012_v28 = vpop.f32.mrb[16].mxu0  ;;  %v1052_v29 = vpop.f32.mrb[16].mxu1 }
 0x11f   : > { %v1013_v30 = vadd.f32 %v1012_v28, %v973_v25  ;;  %v1014_v31 = vpop.f32.mrb[17].mxu0  ;;  %v1054_v32 = vpop.f32.mrb[17].mxu1 }
 0x120   : > { %v1015_v33 = vpop.f32.mrb[18].mxu0  ;;  %v1055_v34 = vpop.f32.mrb[18].mxu1 }
 0x121   : > { %v1053_v35 = vadd.f32 %v1052_v29, %v1013_v30  ;;  %v1016_v36 = vpop.f32.mrb[19].mxu0  ;;  %v1056_v37 = vpop.f32.mrb[19].mxu1 }
 0x126   : > { %v1092_v38 = vpop.f32.mrb[20].mxu0  ;;  %v1132_v39 = vpop.f32.mrb[20].mxu1 }
 0x127   : > { %v1093_v40 = vadd.f32 %v1092_v38, %v1053_v35  ;;  %v1094_v41 = vpop.f32.mrb[21].mxu0  ;;  %v1134_v42 = vpop.f32.mrb[21].mxu1 }
 0x128   : > { %v1095_v43 = vpop.f32.mrb[22].mxu0  ;;  %v1135_v44 = vpop.f32.mrb[22].mxu1 }
 0x129   : > { %v1133_v45 = vadd.f32 %v1132_v39, %v1093_v40  ;;  %v1096_v46 = vpop.f32.mrb[23].mxu0  ;;  %v1136_v47 = vpop.f32.mrb[23].mxu1 }
 0x12e   : > { %v1172_v48 = vpop.f32.mrb[24].mxu0  ;;  %v1212_v16 = vpop.f32.mrb[24].mxu1 }
 0x12f   : > { %v1173_v49 = vadd.f32 %v1172_v48, %v1133_v45  ;;  %v1174_v50 = vpop.f32.mrb[25].mxu0  ;;  %v1214_v51 = vpop.f32.mrb[25].mxu1 }
 0x130   : > { %v1175_v52 = vpop.f32.mrb[26].mxu0  ;;  %v1215_v53 = vpop.f32.mrb[26].mxu1 }
 0x131   : > { %v1213_v54 = vadd.f32 %v1212_v16, %v1173_v49  ;;  %v1176_v55 = vpop.f32.mrb[27].mxu0  ;;  %v1216_v56 = vpop.f32.mrb[27].mxu1 }
 0x136   : > { %v1252_v57 = vpop.f32.mrb[28].mxu0  ;;  %v1292_v15 = vpop.f32.mrb[28].mxu1 }
 0x137   : > { %v1253_v58 = vadd.f32 %v1252_v57, %v1213_v54  ;;  %v1254_v59 = vpop.f32.mrb[29].mxu0  ;;  %v1294_v60 = vpop.f32.mrb[29].mxu1  ;;  %1306 = sbr.rel (%p1640_p10) target bundleno = 328 (0x148), region = 40 }
 0x138   : > { %v1255_v62 = vpop.f32.mrb[30].mxu0  ;;  %v1295_v63 = vpop.f32.mrb[30].mxu1 }
 0x139   : > { %v1293_v0 = vadd.f32 %v1292_v15, %v1253_v58  ;;  %v1256_v1 = vpop.f32.mrb[31].mxu0  ;;  %v1296_v2 = vpop.f32.mrb[31].mxu1 }
 0x13b   : > { %v1298_v3 = vadd.f32 %v1293_v0, %v237_v61 }
 0x13d   : > { %1300 = vst.msk [vmem:[%s1578_s6] sm:$0x3] %vm1299_vm1, %v1298_v3 }
 0x144   : > { %v1307_v4 = vld [vmem:[%s1578_s6] sm:$0x3] }
 0x145   : > { %v1315_v6 = vadd.f32 %v1406_v5, %v1307_v4 }
 0x147   : > { %1316 = vst.msk [vmem:[%s1578_s6] sm:$0x3] %vm1299_vm1, %v1315_v6 }
 0x148 PF: > { %s13_s16 = sadd.s32 1, %s1502_s16   ;;  %s1673_s12 = smov %s1494_s14 }
 0x149   : > { %p10_p11 = scmp.ge.s32.totalorder %s13_s16, 6   ;;  %s1674_s13 = smov %s1498_s15 }
 0x14a   : > { %s1675_s14 = smov %s1678_s17  ;;  %s1676_s15 = smov %s1682_s18 }
 0x14b   :  { %12 = sbr.rel (!%p10_p11) target bundleno = 3 (0x3), region = 73 }

</bundles_post_ra>
